<compile_context>
chip_gen: v5e
topology: v5e:2x2
jax: 0.10.0
libtpu: 0.0.40
codegen_flags: <defaults>
</compile_context>

<pallas_src>
import functools

import jax
import jax.numpy as jnp
from jax.experimental import pallas as pl
from jax.experimental.pallas import tpu as pltpu

BN_EPS = 1e-5


def _round_up(x, m):
    return (x + m - 1) // m * m


# ----------------------------- Pallas kernel --------------------------------
def _vfe_block_kernel(x_ref, *refs, num_vfe, tv, p):
    """One grid step processes `tv` voxels x `p` points, all in one 2-D slab.

    refs = (W0, vec0, Wt1, Wb1, vec1, ..., Wf_top, Wf_bot, bf_pad, o_ref)
      vec_i = [bias; bn_scale; bn_shift]  (3, U_i) f32
    """
    o_ref = refs[-1]
    params = refs[:-1]

    x = x_ref[...]                                            # (tv*p, C_in) bf16
    # mask: does this (voxel, point) have max-over-channels != 0 (ref semantics)
    mask = (jnp.max(x.astype(jnp.float32), axis=-1, keepdims=True)
            != 0.0).astype(jnp.float32)                       # (tv*p, 1)
    mask3 = mask.reshape(tv, p, 1)

    k = 0
    y3 = None    # (tv, p, U)  f32 : point-wise features of current layer
    mx = None    # (tv, U)     f32 : per-voxel max over points
    for li in range(num_vfe):
        if li == 0:
            W = params[k][...]                                # (C_in, U) bf16
            vec = params[k + 1][...]                          # (3, U)   f32
            k += 2
            u = W.shape[1]
            z3 = jnp.dot(x, W,
                         preferred_element_type=jnp.float32).reshape(tv, p, u)
        else:
            Wt = params[k][...]                               # (U_prev, U) bf16
            Wb = params[k + 1][...]                           # (U_prev, U) bf16
            vec = params[k + 2][...]                          # (3, U)      f32
            k += 3
            u = Wt.shape[1]
            # h = concat([y, tile(mx)]) * mask ; h @ W == mask*(y@Wt + bcast(mx@Wb))
            zp = jnp.dot(y3.reshape(tv * p, -1).astype(jnp.bfloat16), Wt,
                         preferred_element_type=jnp.float32)  # (tv*p, U)
            zm = jnp.dot(mx.astype(jnp.bfloat16), Wb,
                         preferred_element_type=jnp.float32)  # (tv, U)
            z3 = mask3 * (zp.reshape(tv, p, u) + zm[:, None, :])
        b = vec[0:1, :]
        scale = vec[1:2, :]
        shift = vec[2:3, :]
        # fcn = Linear+ReLU, then folded eval-mode BatchNorm
        y3 = jnp.maximum(z3 + b, 0.0) * scale + shift         # (tv, p, U)
        mx = jnp.max(y3, axis=1)                              # (tv, U)

    # final_fcn on the masked concat (same split-weight trick), ReLU, max over points
    Wf_top = params[k][...]                                   # (U_last, Fpad) bf16
    Wf_bot = params[k + 1][...]                               # (U_last, Fpad) bf16
    bf_pad = params[k + 2][...]                               # (1, Fpad)      f32
    fdim = Wf_top.shape[1]
    fp = jnp.dot(y3.reshape(tv * p, -1).astype(jnp.bfloat16), Wf_top,
                 preferred_element_type=jnp.float32)          # (tv*p, Fpad)
    fm = jnp.dot(mx.astype(jnp.bfloat16), Wf_bot,
                 preferred_element_type=jnp.float32)          # (tv, Fpad)
    fin3 = jnp.maximum(mask3 * (fp.reshape(tv, p, fdim) + fm[:, None, :]) + bf_pad,
                       0.0)                                   # (tv, p, Fpad)
    o_ref[...] = jnp.max(fin3, axis=1)                        # (tv, Fpad) lane-dense


# ------------------------------- wrapper -------------------------------------
def vfe_block_forward(x_nchw, voxel_coor_buffer, sparse_shape, vfe_params,
                      final_params, *, tv=128):
    """x_nchw: [B, C_in, V, P]; voxel_coor_buffer: int32 [B*V, 4] rows=(b,d,h,w).

    Returns dense voxel features [B, final_dim, D, H, W].
    """
    B, C_in, V, P = x_nchw.shape
    Wf, bf = final_params
    c_last, final_dim = Wf.shape
    num_vfe = len(vfe_params)

    n_vox = B * V
    tv_eff = _round_up(min(tv, n_vox), 8)                     # voxel tile (mult of 8)
    n_pad = _round_up(n_vox, tv_eff)                          # padded voxel count
    f_pad = _round_up(final_dim, 128)                         # lane-dense output width

    # channels-last, bf16 for the dominant activation stream
    # TODO(synk): ideally produce channels-last upstream and skip this transpose.
    x = jnp.transpose(x_nchw.astype(jnp.bfloat16), (0, 2, 3, 1)).reshape(n_vox, P, C_in)
    if n_pad != n_vox:
        x = jnp.concatenate([x, jnp.zeros((n_pad - n_vox, P, C_in), x.dtype)], axis=0)
    x2d = x.reshape(n_pad * P, C_in)                          # 2-D slab

    # fold BN -> (scale, shift); pack (bias, scale, shift) per layer; split concat weights
    flat_params = []
    for li, (W, b, g, be, mu, var) in enumerate(vfe_params):
        scale = g / jnp.sqrt(var + BN_EPS)
        shift = be - mu * scale
        vec = jnp.concatenate([b, scale, shift], axis=0).astype(jnp.float32)  # (3, U)
        Wb16 = W.astype(jnp.bfloat16)
        if li == 0:
            flat_params += [Wb16, vec]
        else:
            u_prev = W.shape[0] // 2
            flat_params += [Wb16[:u_prev], Wb16[u_prev:], vec]
    # final layer: zero-pad to 128 output lanes, split pointwise / pooled halves
    Wf_p = jnp.zeros((c_last, f_pad), jnp.float32).at[:, :final_dim].set(Wf)
    bf_p = jnp.zeros((1, f_pad), jnp.float32).at[:, :final_dim].set(bf)
    u_last = c_last // 2
    flat_params += [Wf_p[:u_last].astype(jnp.bfloat16),
                    Wf_p[u_last:].astype(jnp.bfloat16),
                    bf_p]

    grid = (n_pad // tv_eff,)
    in_specs = [pl.BlockSpec((tv_eff * P, C_in), lambda i: (i, 0))]
    for prm in flat_params:
        in_specs.append(pl.BlockSpec(prm.shape, lambda i, n=prm.ndim: (0,) * n))
    out_specs = pl.BlockSpec((tv_eff, f_pad), lambda i: (i, 0))

    kernel = functools.partial(_vfe_block_kernel, num_vfe=num_vfe, tv=tv_eff, p=P)

    final_padded = pl.pallas_call(
        kernel,
        out_shape=jax.ShapeDtypeStruct((n_pad, f_pad), jnp.float32),
        grid_spec=pltpu.PrefetchScalarGridSpec(
            num_scalar_prefetch=0,
            grid=grid,
            in_specs=in_specs,
            out_specs=out_specs,
        ),
        compiler_params=pltpu.CompilerParams(
            dimension_semantics=("parallel",),
            vmem_limit_bytes=48 * 1024 * 1024),               # fits v7x's 64 MiB/TC
    )(x2d, *flat_params)                                      # (n_pad, f_pad)

    final = final_padded[:n_vox, :final_dim]                  # drop pad rows / lanes

    # Scatter per-voxel features into the dense grid (data-dependent -> plain JAX).
    # TODO(synk): dynamic scatter to [B, D, H, W, F] done with .at[].set outside Pallas.
    D, H, Wd = sparse_shape
    dense = jnp.zeros((B, D, H, Wd, final_dim), jnp.float32)
    dense = dense.at[voxel_coor_buffer[:, 0], voxel_coor_buffer[:, 1],
                     voxel_coor_buffer[:, 2], voxel_coor_buffer[:, 3]].set(final)
    return jnp.transpose(dense, (0, 4, 1, 2, 3))              # [B, F, D, H, W]


# -------------------------- parameter construction ---------------------------
def init_params(key, in_channels, vfe_out_dims, final_dim):
    vfe_params = []
    c_prev = in_channels
    for c_out in vfe_out_dims:
        assert c_out % 2 == 0
        units = c_out // 2
        key, k1, k2, k3, k4 = jax.random.split(key, 5)
        W = jax.random.normal(k1, (c_prev, units), jnp.float32) / jnp.sqrt(float(c_prev))
        b = 0.1 * jax.random.normal(k2, (1, units), jnp.float32)
        gamma = 1.0 + 0.1 * jax.random.normal(k3, (1, units), jnp.float32)
        beta = 0.1 * jax.random.normal(k4, (1, units), jnp.float32)
        mean = jnp.zeros((1, units), jnp.float32)   # BN running stats at init
        var = jnp.ones((1, units), jnp.float32)
        vfe_params.append((W, b, gamma, beta, mean, var))
        c_prev = c_out
    key, kf1, kf2 = jax.random.split(key, 3)
    Wf = jax.random.normal(kf1, (c_prev, final_dim), jnp.float32) / jnp.sqrt(float(c_prev))
    bf = 0.1 * jax.random.normal(kf2, (1, final_dim), jnp.float32)
    return vfe_params, (Wf, bf)


# ---------------------------- pure-JAX reference -----------------------------
def reference_forward(x_nchw, coor, sparse_shape, vfe_params, final_params):
    """Mirrors the kernel numerics (bf16 matmul operands, f32 accumulation)."""
    B, C_in, V, P = x_nchw.shape
    Wf, bf = final_params
    final_dim = Wf.shape[1]
    x = jnp.transpose(x_nchw.astype(jnp.bfloat16), (0, 2, 3, 1))          # [B,V,P,C]
    mask = (jnp.max(x.astype(jnp.float32), axis=-1, keepdims=True)
            != 0.0).astype(jnp.float32)
    h = x
    for (W, b, g, be, mu, var) in vfe_params:
        scale = g[0] / jnp.sqrt(var[0] + BN_EPS)
        shift = be[0] - mu[0] * scale
        y = jnp.einsum("bvpc,cu->bvpu", h, W.astype(jnp.bfloat16),
                       preferred_element_type=jnp.float32) + b[0]
        y = jnp.maximum(y, 0.0) * scale + shift
        mx = jnp.max(y, axis=2, keepdims=True)
        h = (jnp.concatenate([y, jnp.broadcast_to(mx, y.shape)], axis=-1)
             * mask).astype(jnp.bfloat16)
    fin = jnp.einsum("bvpc,cf->bvpf", h, Wf.astype(jnp.bfloat16),
                     preferred_element_type=jnp.float32) + bf[0]
    fin = jnp.max(jnp.maximum(fin, 0.0), axis=2)                          # [B,V,F]
    D, H, Wd = sparse_shape
    dense = jnp.zeros((B, D, H, Wd, final_dim), jnp.float32)
    dense = dense.at[coor[:, 0], coor[:, 1], coor[:, 2], coor[:, 3]].set(
        fin.reshape(B * V, final_dim))
    return jnp.transpose(dense, (0, 4, 1, 2, 3))


# ----------------------------------- main -------------------------------------
if __name__ == "__main__":
    B, C_in, V, P = 2, 4, 16, 8
    vfe_out_dims = [16, 32]
    final_dim = 32
    sparse_shape = (2, 4, 4)          # (D, H, W)

    key = jax.random.PRNGKey(0)
    key, kx, kz = jax.random.split(key, 3)
    x = jax.random.normal(kx, (B, C_in, V, P), jnp.float32)
    # zero out ~30% of points (all channels) so the padding mask is non-trivial
    drop = jax.random.bernoulli(kz, 0.3, (B, 1, V, P)).astype(jnp.float32)
    x = x * (1.0 - drop)

    vfe_params, final_params = init_params(key, C_in, vfe_out_dims, final_dim)

    # voxel_coor_buffer: one (batch, d, h, w) row per voxel, matching flatten order of (B, V)
    D, H, Wd = sparse_shape
    rows = []
    for b in range(B):
        for v in range(V):
            d = v // (H * Wd)
            r = v % (H * Wd)
            rows.append((b, d, r // Wd, r % Wd))
    voxel_coor_buffer = jnp.array(rows, jnp.int32)                       # [B*V, 4]

    fwd = jax.jit(vfe_block_forward, static_argnums=(2,))
    out = jax.block_until_ready(
        fwd(x, voxel_coor_buffer, sparse_shape, vfe_params, final_params))

    ref = reference_forward(x, voxel_coor_buffer, sparse_shape,
                            vfe_params, final_params)
    assert out.shape == (B, final_dim, D, H, Wd), out.shape
    assert jnp.allclose(out, ref, atol=2e-3, rtol=2e-3), \
        float(jnp.max(jnp.abs(out - ref)))
    print("KERNEL_OK")
</pallas_src>

<mosaic_0001>
module attributes {stable_mosaic.version = 11 : i64} {
  func.func @_vfe_block_kernel(%arg0: i32, %arg1: memref<256x4xbf16, #tpu.memory_space<vmem>>, %arg2: memref<4x8xbf16, #tpu.memory_space<vmem>>, %arg3: memref<3x8xf32, #tpu.memory_space<vmem>>, %arg4: memref<8x16xbf16, #tpu.memory_space<vmem>>, %arg5: memref<8x16xbf16, #tpu.memory_space<vmem>>, %arg6: memref<3x16xf32, #tpu.memory_space<vmem>>, %arg7: memref<16x128xbf16, #tpu.memory_space<vmem>>, %arg8: memref<16x128xbf16, #tpu.memory_space<vmem>>, %arg9: memref<1x128xf32, #tpu.memory_space<vmem>>, %arg10: memref<32x128xf32, #tpu.memory_space<vmem>>) attributes {dimension_semantics = [#tpu.dimension_semantics<parallel>], iteration_bounds = array<i64: 1>, scalar_prefetch = 0 : i64, scratch_operands = 0 : i64, tpu.core_type = #tpu.core_type<tc>, window_params = [{transform_indices = @transform_0, window_bounds = array<i64: 256, 4>}, {pipeline_mode = #tpu.pipeline_mode<synchronous>, transform_indices = @transform_1, window_bounds = array<i64: 4, 8>}, {pipeline_mode = #tpu.pipeline_mode<synchronous>, transform_indices = @transform_2, window_bounds = array<i64: 3, 8>}, {pipeline_mode = #tpu.pipeline_mode<synchronous>, transform_indices = @transform_3, window_bounds = array<i64: 8, 16>}, {pipeline_mode = #tpu.pipeline_mode<synchronous>, transform_indices = @transform_4, window_bounds = array<i64: 8, 16>}, {pipeline_mode = #tpu.pipeline_mode<synchronous>, transform_indices = @transform_5, window_bounds = array<i64: 3, 16>}, {pipeline_mode = #tpu.pipeline_mode<synchronous>, transform_indices = @transform_6, window_bounds = array<i64: 16, 128>}, {pipeline_mode = #tpu.pipeline_mode<synchronous>, transform_indices = @transform_7, window_bounds = array<i64: 16, 128>}, {pipeline_mode = #tpu.pipeline_mode<synchronous>, transform_indices = @transform_8, window_bounds = array<i64: 1, 128>}, {transform_indices = @transform_9, window_bounds = array<i64: 32, 128>}]} {
    %c0 = arith.constant 0 : index
    %c0_0 = arith.constant 0 : index
    %0 = vector.load %arg1[%c0, %c0_0] : memref<256x4xbf16, #tpu.memory_space<vmem>>, vector<256x4xbf16>
    %1 = arith.extf %0 : vector<256x4xbf16> to vector<256x4xf32>
    %cst = arith.constant dense<0xFF800000> : vector<256xf32>
    %2 = vector.multi_reduction <maximumf>, %1, %cst [1] : vector<256x4xf32> to vector<256xf32>
    %3 = vector.shape_cast %2 : vector<256xf32> to vector<256x1xf32>
    %cst_1 = arith.constant 0.000000e+00 : f32
    %4 = vector.broadcast %cst_1 : f32 to vector<256x1xf32>
    %5 = arith.cmpf one, %3, %4 : vector<256x1xf32>
    %6 = arith.extui %5 : vector<256x1xi1> to vector<256x1xi32>
    %7 = arith.sitofp %6 : vector<256x1xi32> to vector<256x1xf32>
    %8 = vector.shape_cast %7 : vector<256x1xf32> to vector<32x8x1xf32>
    %c0_2 = arith.constant 0 : index
    %c0_3 = arith.constant 0 : index
    %9 = vector.load %arg2[%c0_2, %c0_3] : memref<4x8xbf16, #tpu.memory_space<vmem>>, vector<4x8xbf16>
    %c0_4 = arith.constant 0 : index
    %c0_5 = arith.constant 0 : index
    %10 = vector.load %arg3[%c0_4, %c0_5] : memref<3x8xf32, #tpu.memory_space<vmem>>, vector<3x8xf32>
    %cst_6 = arith.constant dense<0.000000e+00> : vector<256x8xf32>
    %11 = tpu.matmul %0, %9, %cst_6 {dimension_numbers = #tpu.dot_dimension_numbers<[1], [0], [0], [1], [0, 0, 1, 1], [], []>} : vector<256x4xbf16>, vector<4x8xbf16>, vector<256x8xf32> -> vector<256x8xf32>
    %12 = vector.shape_cast %11 : vector<256x8xf32> to vector<32x8x8xf32>
    %13 = vector.extract_strided_slice %10 {offsets = [0, 0], sizes = [1, 8], strides = [1, 1]} : vector<3x8xf32> to vector<1x8xf32>
    %14 = vector.extract_strided_slice %10 {offsets = [1, 0], sizes = [1, 8], strides = [1, 1]} : vector<3x8xf32> to vector<1x8xf32>
    %15 = vector.extract_strided_slice %10 {offsets = [2, 0], sizes = [1, 8], strides = [1, 1]} : vector<3x8xf32> to vector<1x8xf32>
    %16 = vector.shape_cast %13 : vector<1x8xf32> to vector<1x1x8xf32>
    %17 = vector.broadcast %16 : vector<1x1x8xf32> to vector<32x8x8xf32>
    %18 = arith.addf %12, %17 : vector<32x8x8xf32>
    %cst_7 = arith.constant 0.000000e+00 : f32
    %19 = vector.broadcast %cst_7 : f32 to vector<32x8x8xf32>
    %20 = arith.maximumf %18, %19 : vector<32x8x8xf32>
    %21 = vector.shape_cast %14 : vector<1x8xf32> to vector<1x1x8xf32>
    %22 = vector.broadcast %21 : vector<1x1x8xf32> to vector<32x8x8xf32>
    %23 = arith.mulf %20, %22 : vector<32x8x8xf32>
    %24 = vector.shape_cast %15 : vector<1x8xf32> to vector<1x1x8xf32>
    %25 = vector.broadcast %24 : vector<1x1x8xf32> to vector<32x8x8xf32>
    %26 = arith.addf %23, %25 : vector<32x8x8xf32>
    %cst_8 = arith.constant dense<0xFF800000> : vector<32x8xf32>
    %27 = vector.multi_reduction <maximumf>, %26, %cst_8 [1] : vector<32x8x8xf32> to vector<32x8xf32>
    %c0_9 = arith.constant 0 : index
    %c0_10 = arith.constant 0 : index
    %28 = vector.load %arg4[%c0_9, %c0_10] : memref<8x16xbf16, #tpu.memory_space<vmem>>, vector<8x16xbf16>
    %c0_11 = arith.constant 0 : index
    %c0_12 = arith.constant 0 : index
    %29 = vector.load %arg5[%c0_11, %c0_12] : memref<8x16xbf16, #tpu.memory_space<vmem>>, vector<8x16xbf16>
    %c0_13 = arith.constant 0 : index
    %c0_14 = arith.constant 0 : index
    %30 = vector.load %arg6[%c0_13, %c0_14] : memref<3x16xf32, #tpu.memory_space<vmem>>, vector<3x16xf32>
    %31 = vector.shape_cast %26 : vector<32x8x8xf32> to vector<256x8xf32>
    %32 = arith.truncf %31 : vector<256x8xf32> to vector<256x8xbf16>
    %cst_15 = arith.constant dense<0.000000e+00> : vector<256x16xf32>
    %33 = tpu.matmul %32, %28, %cst_15 {dimension_numbers = #tpu.dot_dimension_numbers<[1], [0], [0], [1], [0, 0, 1, 1], [], []>} : vector<256x8xbf16>, vector<8x16xbf16>, vector<256x16xf32> -> vector<256x16xf32>
    %34 = arith.truncf %27 : vector<32x8xf32> to vector<32x8xbf16>
    %cst_16 = arith.constant dense<0.000000e+00> : vector<32x16xf32>
    %35 = tpu.matmul %34, %29, %cst_16 {dimension_numbers = #tpu.dot_dimension_numbers<[1], [0], [0], [1], [0, 0, 1, 1], [], []>} : vector<32x8xbf16>, vector<8x16xbf16>, vector<32x16xf32> -> vector<32x16xf32>
    %36 = vector.shape_cast %33 : vector<256x16xf32> to vector<32x8x16xf32>
    %37 = vector.shape_cast %35 : vector<32x16xf32> to vector<32x1x16xf32>
    %38 = vector.broadcast %37 : vector<32x1x16xf32> to vector<32x8x16xf32>
    %39 = arith.addf %36, %38 : vector<32x8x16xf32>
    %40 = vector.broadcast %8 : vector<32x8x1xf32> to vector<32x8x16xf32>
    %41 = arith.mulf %40, %39 : vector<32x8x16xf32>
    %42 = vector.extract_strided_slice %30 {offsets = [0, 0], sizes = [1, 16], strides = [1, 1]} : vector<3x16xf32> to vector<1x16xf32>
    %43 = vector.extract_strided_slice %30 {offsets = [1, 0], sizes = [1, 16], strides = [1, 1]} : vector<3x16xf32> to vector<1x16xf32>
    %44 = vector.extract_strided_slice %30 {offsets = [2, 0], sizes = [1, 16], strides = [1, 1]} : vector<3x16xf32> to vector<1x16xf32>
    %45 = vector.shape_cast %42 : vector<1x16xf32> to vector<1x1x16xf32>
    %46 = vector.broadcast %45 : vector<1x1x16xf32> to vector<32x8x16xf32>
    %47 = arith.addf %41, %46 : vector<32x8x16xf32>
    %cst_17 = arith.constant 0.000000e+00 : f32
    %48 = vector.broadcast %cst_17 : f32 to vector<32x8x16xf32>
    %49 = arith.maximumf %47, %48 : vector<32x8x16xf32>
    %50 = vector.shape_cast %43 : vector<1x16xf32> to vector<1x1x16xf32>
    %51 = vector.broadcast %50 : vector<1x1x16xf32> to vector<32x8x16xf32>
    %52 = arith.mulf %49, %51 : vector<32x8x16xf32>
    %53 = vector.shape_cast %44 : vector<1x16xf32> to vector<1x1x16xf32>
    %54 = vector.broadcast %53 : vector<1x1x16xf32> to vector<32x8x16xf32>
    %55 = arith.addf %52, %54 : vector<32x8x16xf32>
    %cst_18 = arith.constant dense<0xFF800000> : vector<32x16xf32>
    %56 = vector.multi_reduction <maximumf>, %55, %cst_18 [1] : vector<32x8x16xf32> to vector<32x16xf32>
    %c0_19 = arith.constant 0 : index
    %c0_20 = arith.constant 0 : index
    %57 = vector.load %arg7[%c0_19, %c0_20] : memref<16x128xbf16, #tpu.memory_space<vmem>>, vector<16x128xbf16>
    %c0_21 = arith.constant 0 : index
    %c0_22 = arith.constant 0 : index
    %58 = vector.load %arg8[%c0_21, %c0_22] : memref<16x128xbf16, #tpu.memory_space<vmem>>, vector<16x128xbf16>
    %c0_23 = arith.constant 0 : index
    %c0_24 = arith.constant 0 : index
    %59 = vector.load %arg9[%c0_23, %c0_24] : memref<1x128xf32, #tpu.memory_space<vmem>>, vector<1x128xf32>
    %60 = vector.shape_cast %55 : vector<32x8x16xf32> to vector<256x16xf32>
    %61 = arith.truncf %60 : vector<256x16xf32> to vector<256x16xbf16>
    %cst_25 = arith.constant dense<0.000000e+00> : vector<256x128xf32>
    %62 = tpu.matmul %61, %57, %cst_25 {dimension_numbers = #tpu.dot_dimension_numbers<[1], [0], [0], [1], [0, 0, 1, 1], [], []>} : vector<256x16xbf16>, vector<16x128xbf16>, vector<256x128xf32> -> vector<256x128xf32>
    %63 = arith.truncf %56 : vector<32x16xf32> to vector<32x16xbf16>
    %cst_26 = arith.constant dense<0.000000e+00> : vector<32x128xf32>
    %64 = tpu.matmul %63, %58, %cst_26 {dimension_numbers = #tpu.dot_dimension_numbers<[1], [0], [0], [1], [0, 0, 1, 1], [], []>} : vector<32x16xbf16>, vector<16x128xbf16>, vector<32x128xf32> -> vector<32x128xf32>
    %65 = vector.shape_cast %62 : vector<256x128xf32> to vector<32x8x128xf32>
    %66 = vector.shape_cast %64 : vector<32x128xf32> to vector<32x1x128xf32>
    %67 = vector.broadcast %66 : vector<32x1x128xf32> to vector<32x8x128xf32>
    %68 = arith.addf %65, %67 : vector<32x8x128xf32>
    %69 = vector.broadcast %8 : vector<32x8x1xf32> to vector<32x8x128xf32>
    %70 = arith.mulf %69, %68 : vector<32x8x128xf32>
    %71 = vector.shape_cast %59 : vector<1x128xf32> to vector<1x1x128xf32>
    %72 = vector.broadcast %71 : vector<1x1x128xf32> to vector<32x8x128xf32>
    %73 = arith.addf %70, %72 : vector<32x8x128xf32>
    %cst_27 = arith.constant 0.000000e+00 : f32
    %74 = vector.broadcast %cst_27 : f32 to vector<32x8x128xf32>
    %75 = arith.maximumf %73, %74 : vector<32x8x128xf32>
    %cst_28 = arith.constant dense<0xFF800000> : vector<32x128xf32>
    %76 = vector.multi_reduction <maximumf>, %75, %cst_28 [1] : vector<32x8x128xf32> to vector<32x128xf32>
    %c0_29 = arith.constant 0 : index
    %c0_30 = arith.constant 0 : index
    %77 = vector.load %arg10[%c0_29, %c0_30] : memref<32x128xf32, #tpu.memory_space<vmem>>, vector<32x128xf32>
    tpu.vector_store %arg10[%c0_29, %c0_30], %76 {strides = array<i32>} : memref<32x128xf32, #tpu.memory_space<vmem>>, vector<32x128xf32>,
    return
  }
  func.func @transform_0(%arg0: i32) -> (i32, i32) {
    %c0_i32 = arith.constant 0 : i32
    %c0_i32_0 = arith.constant 0 : i32
    return %arg0, %c0_i32 : i32, i32
  }
  func.func @transform_1(%arg0: i32) -> (i32, i32) {
    %c0_i32 = arith.constant 0 : i32
    %c0_i32_0 = arith.constant 0 : i32
    %c0_i32_1 = arith.constant 0 : i32
    return %c0_i32, %c0_i32_0 : i32, i32
  }
  func.func @transform_2(%arg0: i32) -> (i32, i32) {
    %c0_i32 = arith.constant 0 : i32
    %c0_i32_0 = arith.constant 0 : i32
    %c0_i32_1 = arith.constant 0 : i32
    return %c0_i32, %c0_i32_0 : i32, i32
  }
  func.func @transform_3(%arg0: i32) -> (i32, i32) {
    %c0_i32 = arith.constant 0 : i32
    %c0_i32_0 = arith.constant 0 : i32
    %c0_i32_1 = arith.constant 0 : i32
    return %c0_i32, %c0_i32_0 : i32, i32
  }
  func.func @transform_4(%arg0: i32) -> (i32, i32) {
    %c0_i32 = arith.constant 0 : i32
    %c0_i32_0 = arith.constant 0 : i32
    %c0_i32_1 = arith.constant 0 : i32
    return %c0_i32, %c0_i32_0 : i32, i32
  }
  func.func @transform_5(%arg0: i32) -> (i32, i32) {
    %c0_i32 = arith.constant 0 : i32
    %c0_i32_0 = arith.constant 0 : i32
    %c0_i32_1 = arith.constant 0 : i32
    return %c0_i32, %c0_i32_0 : i32, i32
  }
  func.func @transform_6(%arg0: i32) -> (i32, i32) {
    %c0_i32 = arith.constant 0 : i32
    %c0_i32_0 = arith.constant 0 : i32
    %c0_i32_1 = arith.constant 0 : i32
    return %c0_i32, %c0_i32_0 : i32, i32
  }
  func.func @transform_7(%arg0: i32) -> (i32, i32) {
    %c0_i32 = arith.constant 0 : i32
    %c0_i32_0 = arith.constant 0 : i32
    %c0_i32_1 = arith.constant 0 : i32
    return %c0_i32, %c0_i32_0 : i32, i32
  }
  func.func @transform_8(%arg0: i32) -> (i32, i32) {
    %c0_i32 = arith.constant 0 : i32
    %c0_i32_0 = arith.constant 0 : i32
    %c0_i32_1 = arith.constant 0 : i32
    return %c0_i32, %c0_i32_0 : i32, i32
  }
  func.func @transform_9(%arg0: i32) -> (i32, i32) {
    %c0_i32 = arith.constant 0 : i32
    %c0_i32_0 = arith.constant 0 : i32
    return %arg0, %c0_i32 : i32, i32
  }
}

</mosaic_0001>

<bundles_post_ra>
// kernel: vfe_block_forward.1
= control target key start
LH: loop header
LB: loop body
LE: loop exit
PB: predicated region body
PF: predicated region fallthrough
CT: control target
= control target key end

     0   :  { %vm420_vm0 = vcmask 1041408   ;;  %vm97_vm1 = vcmask 31744   ;;  %vm936_vm2 = vcmask 1043456   ;;  %vm644_vm3 = vcmask 64512   ;;  %s3970_s1 = inlined_call_operand.vmem [shape: bf16[4,8], index: 1, kind: input, shape index: {}]   ;;  %s3971_s0 = inlined_call_operand.vmem [shape: bf16[256,4], index: 0, kind: input, shape index: {}]   ;;  %s3972_s3 = inlined_call_operand.vmem [shape: bf16[8,16], index: 3, kind: input, shape index: {}]   ;;  %s3973_s2 = inlined_call_operand.vmem [shape: f32[3,8], index: 2, kind: input, shape index: {}]   ;;  %s3974_s4 = inlined_call_operand.vmem [shape: bf16[8,16], index: 4, kind: input, shape index: {}]   ;;  %s3975_s6 = inlined_call_operand.vmem [shape: bf16[16,128], index: 6, kind: input, shape index: {}]   ;;  %s3976_s5 = inlined_call_operand.vmem [shape: f32[3,16], index: 5, kind: input, shape index: {}]   ;;  %s3977_s7 = inlined_call_operand.vmem [shape: bf16[16,128], index: 7, kind: input, shape index: {}]   ;;  %s3978_s8 = inlined_call_operand.vmem [shape: f32[1,128], index: 8, kind: input, shape index: {}]   ;;  %s3979_s9 = inlined_call_operand.vmem [shape: f32[32,128], index: 9, kind: output, shape index: {}]  }
   0x1   :  { %v290_v0 = vld [vmem:[%s3970_s1] sm:$0x3]  ;;  %v2675_v3 = vld [vmem:[%s3971_s0 + $0x8] sm:$0xff]  ;;  %v2676_v4 = vld [vmem:[%s3971_s0 + $0x10] sm:$0xff]  ;;  %vm1125_vm4 = vcmask 1041409   ;;  %vm1127_vm5 = vcmask 1042434  }
   0x2   :  { %v422_v1 = vsel %vm420_vm0, %v290_v0, 0  ;;  %v2674_v2 = vld [vmem:[%s3971_s0] sm:$0xff]  ;;  %v2687_v5 = vld [vmem:[%s3971_s0 + $0x68] sm:$0xff]  ;;  %v2677_v6 = vld [vmem:[%s3971_s0 + $0x18] sm:$0xff]  ;;  %vm1129_vm6 = vcmask 1043459   ;;  %vm1131_vm7 = vcmask 1044484  }
   0x3   :  { %431 = vmatpush.bf16.msra.mxu0 %v422_v1  ;;  %2692 = vmatpush.bf16.msra.mxu2 %v422_v1  ;;  %v2688_v7 = vld [vmem:[%s3971_s0 + $0x70] sm:$0xff]  ;;  %v2678_v8 = vld [vmem:[%s3971_s0 + $0x20] sm:$0xff]  ;;  %v2689_v9 = vld [vmem:[%s3971_s0 + $0x78] sm:$0xff]  ;;  %vm1133_vm8 = vcmask 1045509   ;;  %vm1135_vm9 = vcmask 1046534   ;;  %vm3994_vm10 = vcmask 1047559  }
   0x4   :  { %v2679_v10 = vld [vmem:[%s3971_s0 + $0x28] sm:$0xff]  ;;  %v2680_v11 = vld [vmem:[%s3971_s0 + $0x30] sm:$0xff]  ;;  %v869_v12 = vld [vmem:[%s3972_s3] sm:$0xf] }
   0x5   :  { %v2681_v13 = vld [vmem:[%s3971_s0 + $0x38] sm:$0xff]  ;;  %v938_v14 = vsel %vm936_vm2, %v869_v12, 0  ;;  %v291_v15 = vld [vmem:[%s3973_s2] sm:$0x7]  ;;  %v2683_v35 = vld [vmem:[%s3971_s0 + $0x48] sm:$0xff] }
   0x6   :  { %2614 = vmatmul.msk.bf16.vlgmr.msra.gmra.mxu0 %vm97_vm1, %v2674_v2  ;;  %2627 = vmatmul.msk.bf16.vlgmr.msra.gmra.mxu2 %vm97_vm1, %v2687_v5  ;;  %v2802_v16 = vperm.slane %v291_v15, 0  ;;  %v2682_v17 = vld [vmem:[%s3971_s0 + $0x40] sm:$0xff]  ;;  %v2808_v20 = vperm.slane %v291_v15, 1  ;;  %v2810_v22 = vperm.slane %v291_v15, 2  ;;  %v2684_v0 = vld [vmem:[%s3971_s0 + $0x50] sm:$0xff] }
   0x7   :  { %947 = vmatpush.bf16.msra.mxu1 %v938_v14  ;;  %2693 = vmatpush.bf16.msrb.mxu2 %v938_v14  ;;  %v870_v26 = vld [vmem:[%s3974_s4] sm:$0xf] }
   0x8   :  { %v1169_v29 = vsel %vm936_vm2, %v870_v26, 0 }
   0xb   :  { %1178 = vmatpush.bf16.msra.mxu2 %v1169_v29 }
  0x16   :  { %2615 = vmatmul.msk.bf16.gmra.mxu0 %vm97_vm1, %v2675_v3  ;;  %2628 = vmatmul.msk.bf16.gmra.mxu2 %vm97_vm1, %v2688_v7 }
  0x26   :  { %2616 = vmatmul.msk.bf16.gmra.mxu0 %vm97_vm1, %v2676_v4  ;;  %2629 = vmatmul.msk.bf16.gmra.mxu2 %vm97_vm1, %v2689_v9 }
  0x36   :  { %2617 = vmatmul.msk.bf16.gmra.mxu0 %vm97_vm1, %v2677_v6 }
  0x46   :  { %2618 = vmatmul.msk.bf16.gmra.mxu0 %vm97_vm1, %v2678_v8 }
  0x56   :  { %2619 = vmatmul.msk.bf16.gmra.mxu0 %vm97_vm1, %v2679_v10 }
  0x66   :  { %2620 = vmatmul.msk.bf16.gmra.mxu0 %vm97_vm1, %v2680_v11 }
  0x76   :  { %2621 = vmatmul.msk.bf16.gmra.mxu0 %vm97_vm1, %v2681_v13 }
  0x83   :  { %v433_v18 = vpop.f32.mrf.mxu0 }
  0x84   :  { %v514_v19 = vadd.f32 %v2802_v16, %v433_v18 }
  0x86   :  { %v546_v21 = vmax.f32 %v514_v19, 0.0  ;;  %2622 = vmatmul.msk.bf16.gmra.mxu0 %vm97_vm1, %v2682_v17 }
  0x88   :  { %v579_v23 = vmul.f32 %v2808_v20, %v546_v21 }
  0x8a   :  { %v612_v24 = vadd.f32 %v2810_v22, %v579_v23 }
  0x8b   :  { %v435_v25 = vpop.f32.mrf.mxu0 }
  0x8c   :  { %v645_v27 = vsel %vm644_vm3, %v612_v24, -inf  ;;  %v515_v28 = vadd.f32 %v2802_v16, %v435_v25 }
  0x8d   :  { %v646_v30 = vrot.slane %v645_v27, 4 }
  0x8e   :  { %v547_v31 = vmax.f32 %v515_v28, 0.0 }
  0x8f   :  { %v647_v32 = vmax.f32 %v645_v27, %v646_v30 }
  0x90   :  { %v580_v33 = vmul.f32 %v2808_v20, %v547_v31 }
  0x91   :  { %v648_v34 = vrot.slane %v647_v32, 2 }
  0x92   :  { %v613_v36 = vadd.f32 %v2810_v22, %v580_v33 }
  0x93   :  { %v649_v37 = vmax.f32 %v647_v32, %v648_v34  ;;  %v438_v38 = vpop.f32.mrf.mxu0 }
  0x94   :  { %v516_v39 = vadd.f32 %v2802_v16, %v438_v38  ;;  %v652_v40 = vsel %vm644_vm3, %v613_v36, -inf  ;;  %v872_v41 = vpack.c.bf16 %v613_v36, %v612_v24  ;;  %v498_v24 = vpop.f32.mrf.mxu2 }
  0x95   :  { %v653_v42 = vrot.slane %v652_v40, 4  ;;  %v650_v44 = vrot.slane %v649_v37, 1 }
  0x96   :  { %v548_v43 = vmax.f32 %v516_v39, 0.0  ;;  %2623 = vmatmul.msk.bf16.gmra.mxu0 %vm97_vm1, %v2683_v35  ;;  %2630 = vmatmul.msk.bf16.vlgmr.msra.gmra.mxu1 %vm644_vm3, %v872_v41 }
  0x97   :  { %v654_v45 = vmax.f32 %v652_v40, %v653_v42  ;;  %v651_v49 = vmax.f32 %v649_v37, %v650_v44  ;;  %v2685_v37 = vld [vmem:[%s3971_s0 + $0x58] sm:$0xff] }
  0x98   :  { %v581_v46 = vmul.f32 %v2808_v20, %v548_v43 }
  0x99   :  { %v655_v47 = vrot.slane %v654_v45, 2  ;;  %v1029_v57 = vpack.c.bf16 %v651_v49, %v651_v49 }
  0x9a   :  { %v614_v48 = vadd.f32 %v2810_v22, %v581_v46 }
  0x9b   :  { %v656_v50 = vmax.f32 %v654_v45, %v655_v47  ;;  %v440_v51 = vpop.f32.mrf.mxu0  ;;  %v1093_v1 = vunpack.c.l.b16 %v1029_v57  ;;  %v540_v45 = vadd.f32 %v2802_v16, %v498_v24 }
  0x9c   :  { %v659_v52 = vsel %vm644_vm3, %v614_v48, -inf  ;;  %v517_v53 = vadd.f32 %v2802_v16, %v440_v51  ;;  %v500_v41 = vpop.f32.mrf.mxu2 }
  0x9d   :  { %v660_v54 = vrot.slane %v659_v52, 4  ;;  %v657_v55 = vrot.slane %v656_v50, 1  ;;  %v541_v49 = vadd.f32 %v2802_v16, %v500_v41  ;;  %v572_v51 = vmax.f32 %v540_v45, 0.0  ;;  %v39_v45 = vld [vmem:[%s3971_s0 + $0x18] sm:$0xff]  }
  0x9e   :  { %v549_v56 = vmax.f32 %v517_v53, 0.0 }
  0x9f   :  { %v661_v58 = vmax.f32 %v659_v52, %v660_v54  ;;  %v658_v59 = vmax.f32 %v656_v50, %v657_v55  ;;  %v573_v54 = vmax.f32 %v541_v49, 0.0 }
  0xa0   :  { %v582_v60 = vmul.f32 %v2808_v20, %v549_v56  ;;  %v605_v56 = vmul.f32 %v2808_v20, %v572_v51 }
  0xa1   :  { %v662_v61 = vrot.slane %v661_v58, 2  ;;  %v1030_v62 = vpack.c.bf16 %v658_v59, %v658_v59  ;;  %v606_v59 = vmul.f32 %v2808_v20, %v573_v54 }
  0xa2   :  { %v615_v63 = vadd.f32 %v2810_v22, %v582_v60 }
  0xa3   :  { %v663_v2 = vmax.f32 %v661_v58, %v662_v61  ;;  %v1094_v3 = vunpack.c.l.b16 %v1030_v62  ;;  %v443_v4 = vpop.f32.mrf.mxu0  ;;  %v2866_v61 = vadd.f32 %v2810_v22, %v605_v56 }
  0xa4   :  { %v666_v5 = vsel %vm644_vm3, %v615_v63, -inf  ;;  %v518_v6 = vadd.f32 %v2802_v16, %v443_v4  ;;  %v873_v7 = vpack.c.bf16 %v615_v63, %v614_v48 }
  0xa5   :  { %v664_v8 = vrot.slane %v663_v2, 1  ;;  %v1126_v9 = vsel %vm1125_vm4, %v1094_v3, %v1093_v1  ;;  %v667_v10 = vrot.slane %v666_v5, 4  ;;  %v2869_v1 = vadd.f32 %v2810_v22, %v606_v59 }
  0xa6   :  { %v550_v11 = vmax.f32 %v518_v6, 0.0  ;;  %2624 = vmatmul.msk.bf16.gmra.mxu0 %vm97_vm1, %v2684_v0  ;;  %2631 = vmatmul.msk.bf16.gmra.mxu1 %vm644_vm3, %v873_v7 }
  0xa7   :  { %v665_v12 = vmax.f32 %v663_v2, %v664_v8  ;;  %v668_v13 = vmax.f32 %v666_v5, %v667_v10  ;;  %v503_v2 = vpop.f32.mrf.mxu2  ;;  %v885_v8 = vpack.c.bf16 %v2869_v1, %v2866_v61 }
  0xa8   :  { %v583_v14 = vmul.f32 %v2808_v20, %v550_v11 }
  0xa9   :  { %v1031_v15 = vpack.c.bf16 %v665_v12, %v665_v12  ;;  %v669_v17 = vrot.slane %v668_v13, 2  ;;  %2643 = vmatmul.msk.bf16.vlgmr.msrb.gmra.mxu2 %vm644_vm3, %v885_v8 }
  0xaa   :  { %v616_v18 = vadd.f32 %v2810_v22, %v583_v14 }
  0xab   :  { %v1095_v19 = vunpack.c.l.b16 %v1031_v15  ;;  %v670_v21 = vmax.f32 %v668_v13, %v669_v17  ;;  %v445_v23 = vpop.f32.mrf.mxu0  ;;  %v2686_v17 = vld [vmem:[%s3971_s0 + $0x60] sm:$0xff] }
  0xac   :  { %v673_v25 = vsel %vm644_vm3, %v616_v18, -inf  ;;  %v519_v26 = vadd.f32 %v2802_v16, %v445_v23 }
  0xad   :  { %v671_v27 = vrot.slane %v670_v21, 1  ;;  %v1128_v28 = vsel %vm1127_vm5, %v1095_v19, %v1126_v9  ;;  %v674_v29 = vrot.slane %v673_v25, 4 }
  0xae   :  { %v551_v30 = vmax.f32 %v519_v26, 0.0  ;;  %v542_v26 = vadd.f32 %v2802_v16, %v503_v2 }
  0xaf   :  { %v672_v31 = vmax.f32 %v670_v21, %v671_v27  ;;  %v675_v32 = vmax.f32 %v673_v25, %v674_v29  ;;  %v505_v23 = vpop.f32.mrf.mxu2 }
  0xb0   :  { %v584_v33 = vmul.f32 %v2808_v20, %v551_v30  ;;  %v574_v29 = vmax.f32 %v542_v26, 0.0  ;;  %v543_v30 = vadd.f32 %v2802_v16, %v505_v23 }
  0xb1   :  { %v1032_v34 = vpack.c.bf16 %v672_v31, %v672_v31  ;;  %v676_v35 = vrot.slane %v675_v32, 2 }
  0xb2   :  { %v617_v36 = vadd.f32 %v2810_v22, %v584_v33 }
  0xb3   :  { %v1096_v38 = vunpack.c.l.b16 %v1032_v34  ;;  %v677_v39 = vmax.f32 %v675_v32, %v676_v35  ;;  %v448_v40 = vpop.f32.mrf.mxu0  ;;  %v607_v34 = vmul.f32 %v2808_v20, %v574_v29  ;;  %v575_v35 = vmax.f32 %v543_v30, 0.0 }
  0xb4   :  { %v680_v42 = vsel %vm644_vm3, %v617_v36, -inf  ;;  %v520_v43 = vadd.f32 %v2802_v16, %v448_v40  ;;  %v874_v44 = vpack.c.bf16 %v617_v36, %v616_v18  ;;  %v41_v36 = vld [vmem:[%s3971_s0 + $0x20] sm:$0xff]  }
  0xb5   :  { %v1130_v46 = vsel %vm1129_vm6, %v1096_v38, %v1128_v28  ;;  %v678_v47 = vrot.slane %v677_v39, 1  ;;  %v681_v48 = vrot.slane %v680_v42, 4  ;;  %v73_v40 = vunpack.c.l.bf16 %v41_v36 }
  0xb6   :  { %v552_v50 = vmax.f32 %v520_v43, 0.0  ;;  %2625 = vmatmul.msk.bf16.gmra.mxu0 %vm97_vm1, %v2685_v37  ;;  %2632 = vmatmul.msk.bf16.gmra.mxu1 %vm644_vm3, %v874_v44  ;;  %v2895_v43 = vadd.f32 %v2810_v22, %v607_v34 }
  0xb7   :  { %v679_v52 = vmax.f32 %v677_v39, %v678_v47  ;;  %v682_v53 = vmax.f32 %v680_v42, %v681_v48  ;;  %v608_v39 = vmul.f32 %v2808_v20, %v575_v35  ;;  %v508_v44 = vpop.f32.mrf.mxu2  ;;  %v122_v49 = vsel %vm97_vm1, %v73_v40, -inf }
  0xb8   :  { %v585_v55 = vmul.f32 %v2808_v20, %v552_v50  ;;  %123 = vmax.xlane.f32.xlu1 %v122_v49 }
  0xb9   :  { %v1033_v57 = vpack.c.bf16 %v679_v52, %v679_v52  ;;  %v683_v58 = vrot.slane %v682_v53, 2  ;;  %v2902_v48 = vadd.f32 %v2810_v22, %v608_v39  ;;  %v71_v52 = vunpack.c.l.bf16 %v39_v45 }
  0xba   :  { %v618_v60 = vadd.f32 %v2810_v22, %v585_v55 }
  0xbb   :  { %v1097_v62 = vunpack.c.l.b16 %v1033_v57  ;;  %v684_v63 = vmax.f32 %v682_v53, %v683_v58  ;;  %v450_v0 = vpop.f32.mrf.mxu0  ;;  %v116_v55 = vsel %vm97_vm1, %v71_v52, -inf  ;;  %v886_v56 = vpack.c.bf16 %v2902_v48, %v2895_v43 }
  0xbc   :  { %v687_v3 = vsel %vm644_vm3, %v618_v60, -inf  ;;  %v521_v4 = vadd.f32 %v2802_v16, %v450_v0  ;;  %117 = vmax.xlane.f32.xlu0 %v116_v55 }
  0xbd   :  { %v1132_v5 = vsel %vm1131_vm7, %v1097_v62, %v1130_v46  ;;  %v685_v6 = vrot.slane %v684_v63, 1  ;;  %v688_v7 = vrot.slane %v687_v3, 4  ;;  %2644 = vmatmul.msk.bf16.gmra.mxu2 %vm644_vm3, %v886_v56 }
  0xbe   :  { %v553_v9 = vmax.f32 %v521_v4, 0.0  ;;  %v72_v4 = vunpack.c.h.bf16 %v39_v45  ;;  %v48_v45 = vld [vmem:[%s3971_s0 + $0x3c] sm:$0xf] }
  0xbf   :  { %v686_v10 = vmax.f32 %v684_v63, %v685_v6  ;;  %v689_v11 = vmax.f32 %v687_v3, %v688_v7  ;;  %v510_v0 = vpop.f32.mrf.mxu2  ;;  %v544_v3 = vadd.f32 %v2802_v16, %v508_v44 }
  0xc0   :  { %v586_v12 = vmul.f32 %v2808_v20, %v553_v9  ;;  %v545_v7 = vadd.f32 %v2802_v16, %v510_v0 }
  0xc1   :  { %v1034_v13 = vpack.c.bf16 %v686_v10, %v686_v10  ;;  %v690_v14 = vrot.slane %v689_v11, 2  ;;  %v576_v6 = vmax.f32 %v544_v3, 0.0 }
  0xc2   :  { %v619_v15 = vadd.f32 %v2810_v22, %v586_v12  ;;  %v119_v12 = vsel %vm97_vm1, %v72_v4, -inf }
  0xc3   :  { %v1098_v18 = vunpack.c.l.b16 %v1034_v13  ;;  %v691_v19 = vmax.f32 %v689_v11, %v690_v14  ;;  %v453_v21 = vpop.f32.mrf.mxu0  ;;  %v609_v10 = vmul.f32 %v2808_v20, %v576_v6  ;;  %v577_v11 = vmax.f32 %v545_v7, 0.0  ;;  %v43_v13 = vld [vmem:[%s3971_s0 + $0x28] sm:$0xff]  }
  0xc4   :  { %v694_v24 = vsel %vm644_vm3, %v619_v15, -inf  ;;  %v875_v25 = vpack.c.bf16 %v619_v15, %v618_v60  ;;  %v522_v28 = vadd.f32 %v2802_v16, %v453_v21  ;;  %v74_v60 = vunpack.c.h.bf16 %v41_v36  ;;  %120 = vmax.xlane.f32.xlu0 %v119_v12  ;;  %v46_v21 = vld [vmem:[%s3971_s0 + $0x34] sm:$0xff]   ;;  %v2952_v36 = vld [vmem:[%s3971_s0 + $0x40] sm:$0xff]  }
  0xc5   :  { %v692_v27 = vrot.slane %v691_v19, 1  ;;  %v1134_v31 = vsel %vm1133_vm8, %v1098_v18, %v1132_v5  ;;  %v695_v33 = vrot.slane %v694_v24, 4  ;;  %v610_v15 = vmul.f32 %v2808_v20, %v577_v11 }
  0xc6   :  { %2626 = vmatmul.msk.bf16.gmra.mxu0 %vm97_vm1, %v2686_v17  ;;  %2633 = vmatmul.msk.bf16.gmra.mxu1 %vm644_vm3, %v875_v25  ;;  %v554_v38 = vmax.f32 %v522_v28, 0.0  ;;  %v125_v8 = vsel %vm97_vm1, %v74_v60, -inf  ;;  %v75_v17 = vunpack.c.l.bf16 %v43_v13  ;;  %v45_v28 = vld [vmem:[%s3971_s0 + $0x30] sm:$0xf]  ;;  %v78_v30 = vunpack.c.l.bf16 %v46_v21 }
  0xc7   :  { %v693_v32 = vmax.f32 %v691_v19, %v692_v27  ;;  %v696_v41 = vmax.f32 %v694_v24, %v695_v33  ;;  %126 = vmax.xlane.f32.xlu1 %v125_v8  ;;  %v2935_v24 = vadd.f32 %v2810_v22, %v609_v10  ;;  %v2938_v25 = vadd.f32 %v2810_v22, %v610_v15 }
  0xc8   :  { %v587_v50 = vmul.f32 %v2808_v20, %v554_v38  ;;  %v128_v26 = vsel %vm97_vm1, %v75_v17, -inf  ;;  %v137_v33 = vsel %vm97_vm1, %v78_v30, -inf  ;;  %v77_v34 = vunpack.c.l.bf16 %v45_v28 }
  0xc9   :  { %v1035_v37 = vpack.c.bf16 %v693_v32, %v693_v32  ;;  %v697_v53 = vrot.slane %v696_v41, 2  ;;  %129 = vmax.xlane.f32.xlu2 %v128_v26  ;;  %v887_v35 = vpack.c.bf16 %v2938_v25, %v2935_v24  ;;  %v76_v40 = vunpack.c.h.bf16 %v43_v13  ;;  %v3002_v26 = vld [vmem:[%s3971_s0 + $0x54] sm:$0xff]  }
  0xca   :  { %v2914_v58 = vadd.f32 %v2810_v22, %v587_v50  ;;  %v134_v39 = vsel %vm97_vm1, %v77_v34, -inf }
  0xcb   :  { %v455_v42 = vpop.f32.mrf.mxu0  ;;  %v1099_v46 = vunpack.c.l.b16 %v1035_v37  ;;  %v698_v62 = vmax.f32 %v696_v41, %v697_v53  ;;  %v81_v41 = vunpack.c.l.bf16 %v2952_v36  ;;  %v131_v49 = vsel %vm97_vm1, %v76_v40, -inf }
  0xcc   :  { %v523_v47 = vadd.f32 %v2802_v16, %v455_v42  ;;  %135 = vmax.xlane.f32.xlu0 %v134_v39  ;;  %v80_v53 = vunpack.c.l.bf16 %v48_v45  ;;  %v701_v55 = vsel %vm644_vm3, %v2914_v58, -inf }
  0xcd   :  { %v2911_v57 = vsel %vm1135_vm9, %v1099_v46, %v1134_v31  ;;  %v699_v9 = vrot.slane %v698_v62, 1  ;;  %2645 = vmatmul.msk.bf16.gmra.mxu2 %vm644_vm3, %v887_v35  ;;  %v146_v52 = vsel %vm97_vm1, %v81_v41, -inf }
  0xce   :  { %v555_v51 = vmax.f32 %v523_v47, 0.0  ;;  %v143_v60 = vsel %vm97_vm1, %v80_v53, -inf }
  0xcf   :  { %v700_v18 = vmax.f32 %v698_v62, %v699_v9  ;;  %138 = vmax.xlane.f32.xlu1 %v137_v33 }
  0xd0   :  { %v588_v54 = vmul.f32 %v2808_v20, %v555_v51 }
  0xd1   :  { %v1036_v31 = vpack.c.bf16 %v700_v18, %v700_v18  ;;  %132 = vmax.xlane.f32.xlu2 %v131_v49 }
  0xd2   :  { %v621_v59 = vadd.f32 %v2810_v22, %v588_v54 }
  0xd3   :  { %v458_v63 = vpop.f32.mrf.mxu0  ;;  %v1100_v42 = vunpack.c.l.b16 %v1036_v31 }
  0xd4   :  { %v876_v2 = vpack.c.bf16 %v621_v59, %v2914_v58  ;;  %v524_v5 = vadd.f32 %v2802_v16, %v458_v63  ;;  %v708_v50 = vsel %vm644_vm3, %v621_v59, -inf  ;;  %v2978_v59 = vld [vmem:[%s3971_s0 + $0x4c] sm:$0xff]   ;;  %v79_v63 = vunpack.c.h.bf16 %v46_v21  ;;  %144 = vmax.xlane.f32.xlu0 %v143_v60 }
  0xd5   :  { %v2969_v54 = vsel %vm3994_vm10, %v1100_v42, %v2911_v57  ;;  %v709_v62 = vrot.slane %v708_v50, 4  ;;  %v51_v57 = vld [vmem:[%s3971_s0 + $0x48] sm:$0xf]  ;;  %v84_v58 = vunpack.c.l.bf16 %v2978_v59 }
  0xd6   :  { %2634 = vmatmul.msk.bf16.gmra.mxu1 %vm644_vm3, %v876_v2  ;;  %v556_v14 = vmax.f32 %v524_v5, 0.0  ;;  %v702_v2 = vrot.slane %v701_v55, 4  ;;  %v140_v5 = vsel %vm97_vm1, %v79_v63, -inf  ;;  %v83_v8 = vunpack.c.l.bf16 %v51_v57 }
  0xd7   :  { %147 = vmax.xlane.f32.xlu1 %v146_v52  ;;  %v710_v9 = vmax.f32 %v708_v50, %v709_v62  ;;  %v155_v13 = vsel %vm97_vm1, %v84_v58, -inf }
  0xd8   :  { %v589_v27 = vmul.f32 %v2808_v20, %v556_v14  ;;  %v703_v14 = vmax.f32 %v701_v55, %v702_v2  ;;  %v152_v18 = vsel %vm97_vm1, %v83_v8, -inf }
  0xd9   :  { %141 = vmax.xlane.f32.xlu2 %v140_v5 }
  0xda   :  { %v622_v37 = vadd.f32 %v2810_v22, %v589_v27  ;;  %v711_v27 = vrot.slane %v710_v9, 2  ;;  %v704_v31 = vrot.slane %v703_v14, 2 }
  0xdb   :  { %v460_v19 = vpop.f32.mrf.mxu0 }
  0xdc   :  { %v525_v23 = vadd.f32 %v2802_v16, %v460_v19  ;;  %v715_v3 = vsel %vm644_vm3, %v622_v37, -inf  ;;  %v2996_v19 = vld [vmem:[%s3971_s0] sm:$0xff]   ;;  %153 = vmax.xlane.f32.xlu0 %v152_v18  ;;  %v712_v41 = vmax.f32 %v710_v9, %v711_v27  ;;  %v705_v49 = vmax.f32 %v703_v14, %v704_v31 }
  0xdd   :  { %v716_v10 = vrot.slane %v715_v3, 4  ;;  %v65_v30 = vunpack.c.l.bf16 %v2996_v19 }
  0xde   :  { %v557_v29 = vmax.f32 %v525_v23, 0.0  ;;  %v82_v23 = vunpack.c.h.bf16 %v2952_v36  ;;  %v713_v53 = vrot.slane %v712_v41, 1  ;;  %v706_v57 = vrot.slane %v705_v49, 1 }
  0xdf   :  { %156 = vmax.xlane.f32.xlu1 %v155_v13  ;;  %v717_v28 = vmax.f32 %v715_v3, %v716_v10  ;;  %v98_v45 = vsel %vm97_vm1, %v65_v30, -inf }
  0xe0   :  { %v590_v32 = vmul.f32 %v2808_v20, %v557_v29  ;;  %v149_v34 = vsel %vm97_vm1, %v82_v23, -inf  ;;  %v707_v10 = vmax.f32 %v705_v49, %v706_v57 }
  0xe1   :  { %150 = vmax.xlane.f32.xlu2 %v149_v34  ;;  %v718_v42 = vrot.slane %v717_v28, 2 }
  0xe2   :  { %v623_v38 = vadd.f32 %v2810_v22, %v590_v32 }
  0xe3   :  { %v463_v44 = vpop.f32.mrf.mxu0  ;;  %v719_v55 = vmax.f32 %v717_v28, %v718_v42  ;;  %v1037_v28 = vpack.c.bf16 %v707_v10, %v707_v10 }
  0xe4   :  { %v526_v46 = vadd.f32 %v2802_v16, %v463_v44  ;;  %v877_v47 = vpack.c.bf16 %v623_v38, %v622_v37  ;;  %v722_v6 = vsel %vm644_vm3, %v623_v38, -inf  ;;  %v86_v38 = vunpack.c.l.bf16 %v3002_v26 }
  0xe5   :  { %v723_v15 = vrot.slane %v722_v6, 4  ;;  %v720_v5 = vrot.slane %v719_v55, 1 }
  0xe6   :  { %v558_v51 = vmax.f32 %v526_v46, 0.0  ;;  %2635 = vmatmul.msk.bf16.gmra.mxu1 %vm644_vm3, %v877_v47 }
  0xe7   :  { %v724_v32 = vmax.f32 %v722_v6, %v723_v15  ;;  %99 = vmax.xlane.f32.xlu1 %v98_v45  ;;  %v721_v15 = vmax.f32 %v719_v55, %v720_v5 }
  0xe8   :  { %v591_v56 = vmul.f32 %v2808_v20, %v558_v51  ;;  %v161_v51 = vsel %vm97_vm1, %v86_v38, -inf }
  0xe9   :  { %v725_v46 = vrot.slane %v724_v32, 2  ;;  %162 = vmax.xlane.f32.xlu0 %v161_v51 }
  0xea   :  { %v624_v0 = vadd.f32 %v2810_v22, %v591_v56 }
  0xeb   :  { %v465_v4 = vpop.f32.mrf.mxu0  ;;  %v726_v62 = vmax.f32 %v724_v32, %v725_v46 }
  0xec   :  { %v527_v7 = vadd.f32 %v2802_v16, %v465_v4  ;;  %v729_v11 = vsel %vm644_vm3, %v624_v0, -inf  ;;  %v714_v4 = vmax.f32 %v712_v41, %v713_v53  ;;  %v1101_v41 = vunpack.c.l.b16 %v1037_v28 }
  0xed   :  { %v730_v21 = vrot.slane %v729_v11, 4  ;;  %v727_v8 = vrot.slane %v726_v62, 1 }
  0xee   :  { %v559_v12 = vmax.f32 %v527_v7, 0.0  ;;  %v1038_v14 = vpack.c.bf16 %v714_v4, %v714_v4 }
  0xef   :  { %v731_v39 = vmax.f32 %v729_v11, %v730_v21  ;;  %v728_v21 = vmax.f32 %v726_v62, %v727_v8  ;;  %v87_v62 = vunpack.c.h.bf16 %v3002_v26 }
  0xf0   :  { %v592_v17 = vmul.f32 %v2808_v20, %v559_v12 }
  0xf1   :  { %v732_v52 = vrot.slane %v731_v39, 2  ;;  %v164_v8 = vsel %vm97_vm1, %v87_v62, -inf }
  0xf2   :  { %v625_v29 = vadd.f32 %v2810_v22, %v592_v17  ;;  %165 = vmax.xlane.f32.xlu0 %v164_v8 }
  0xf3   :  { %v468_v33 = vpop.f32.mrf.mxu0  ;;  %v733_v2 = vmax.f32 %v731_v39, %v732_v52  ;;  %v1040_v39 = vpack.c.bf16 %v728_v21, %v728_v21  ;;  %v56_v52 = vld [vmem:[%s3971_s0 + $0x5c] sm:$0xff]  }
  0xf4   :  { %v736_v35 = vsel %vm644_vm3, %v625_v29, -inf  ;;  %v528_v36 = vadd.f32 %v2802_v16, %v468_v33  ;;  %v878_v37 = vpack.c.bf16 %v625_v29, %v624_v0 }
  0xf5   :  { %v737_v40 = vrot.slane %v736_v35, 4  ;;  %v734_v12 = vrot.slane %v733_v2, 1  ;;  %v1104_v53 = vunpack.c.l.b16 %v1040_v39 }
  0xf6   :  { %v560_v44 = vmax.f32 %v528_v36, 0.0  ;;  %2636 = vmatmul.msk.bf16.gmra.mxu1 %vm644_vm3, %v878_v37  ;;  %v1039_v36 = vpack.c.bf16 %v721_v15, %v721_v15 }
  0xf7   :  { %v738_v47 = vmax.f32 %v736_v35, %v737_v40  ;;  %v735_v32 = vmax.f32 %v733_v2, %v734_v12  ;;  %v1102_v35 = vunpack.c.l.b16 %v1038_v14 }
  0xf8   :  { %v593_v50 = vmul.f32 %v2808_v20, %v560_v44  ;;  %v1103_v49 = vunpack.c.l.b16 %v1039_v36  ;;  %v89_v36 = vunpack.c.h.bf16 %v56_v52 }
  0xf9   :  { %v739_v56 = vrot.slane %v738_v47, 2  ;;  %v1041_v45 = vpack.c.bf16 %v735_v32, %v735_v32  ;;  %v66_v32 = vunpack.c.h.bf16 %v2996_v19 }
  0xfa   :  { %v626_v60 = vadd.f32 %v2810_v22, %v593_v50  ;;  %v170_v19 = vsel %vm97_vm1, %v89_v36, -inf  ;;  %v827_v36 = vsel %vm644_vm3, %v2866_v61, -inf }
  0xfb   :  { %v470_v63 = vpop.f32.mrf.mxu0  ;;  %v740_v6 = vmax.f32 %v738_v47, %v739_v56  ;;  %v1139_v47 = vsel %vm1125_vm4, %v1102_v35, %v1101_v41  ;;  %v1105_v2 = vunpack.c.l.b16 %v1041_v45 }
  0xfc   :  { %v743_v0 = vsel %vm644_vm3, %v626_v60, -inf  ;;  %v529_v58 = vadd.f32 %v2802_v16, %v470_v63  ;;  %v1140_v26 = vsel %vm1127_vm5, %v1103_v49, %v1139_v47  ;;  %v35_v49 = vld [vmem:[%s3971_s0 + $0x8] sm:$0xf] }
  0xfd   :  { %v744_v3 = vrot.slane %v743_v0, 4  ;;  %v741_v17 = vrot.slane %v740_v6, 1 }
  0xfe   :  { %v561_v7 = vmax.f32 %v529_v58, 0.0  ;;  %v88_v58 = vunpack.c.l.bf16 %v56_v52 }
  0xff   :  { %v745_v9 = vmax.f32 %v743_v0, %v744_v3  ;;  %v742_v37 = vmax.f32 %v740_v6, %v741_v17 }
 0x100   :  { %v594_v11 = vmul.f32 %v2808_v20, %v561_v7 }
 0x101   :  { %v746_v13 = vrot.slane %v745_v9, 2  ;;  %v1042_v50 = vpack.c.bf16 %v742_v37, %v742_v37 }
 0x102   :  { %v627_v18 = vadd.f32 %v2810_v22, %v594_v11  ;;  %v1141_v11 = vsel %vm1129_vm6, %v1104_v53, %v1140_v26 }
 0x103   :  { %v747_v23 = vmax.f32 %v745_v9, %v746_v13  ;;  %v473_v27 = vpop.f32.mrf.mxu0  ;;  %v1106_v6 = vunpack.c.l.b16 %v1042_v50  ;;  %v1142_v14 = vsel %vm1131_vm7, %v1105_v2, %v1141_v11 }
 0x104   :  { %v750_v29 = vsel %vm644_vm3, %v627_v18, -inf  ;;  %v530_v30 = vadd.f32 %v2802_v16, %v473_v27  ;;  %v879_v31 = vpack.c.bf16 %v627_v18, %v626_v60  ;;  %v85_v60 = vunpack.c.h.bf16 %v2978_v59 }
 0x105   :  { %v748_v33 = vrot.slane %v747_v23, 1  ;;  %v751_v34 = vrot.slane %v750_v29, 4  ;;  %v167_v59 = vsel %vm97_vm1, %v88_v58, -inf  ;;  %v1143_v21 = vsel %vm1133_vm8, %v1106_v6, %v1142_v14 }
 0x106   :  { %v562_v38 = vmax.f32 %v530_v30, 0.0  ;;  %2637 = vmatmul.msk.bf16.gmra.mxu1 %vm644_vm3, %v879_v31  ;;  %v158_v5 = vsel %vm97_vm1, %v85_v60, -inf  ;;  %168 = vmax.xlane.f32.xlu1 %v167_v59 }
 0x107   :  { %v752_v40 = vmax.f32 %v750_v29, %v751_v34  ;;  %v749_v42 = vmax.f32 %v747_v23, %v748_v33  ;;  %159 = vmax.xlane.f32.xlu2 %v158_v5  ;;  %v36_v23 = vld [vmem:[%s3971_s0 + $0xc] sm:$0xff]  }
 0x108   :  { %v595_v44 = vmul.f32 %v2808_v20, %v562_v38  ;;  %v68_v31 = vunpack.c.l.bf16 %v36_v23 }
 0x109   :  { %v753_v46 = vrot.slane %v752_v40, 2  ;;  %v1043_v63 = vpack.c.bf16 %v749_v42, %v749_v42  ;;  %v101_v42 = vsel %vm97_vm1, %v66_v32, -inf }
 0x10a   :  { %v628_v51 = vadd.f32 %v2810_v22, %v595_v44  ;;  %v107_v39 = vsel %vm97_vm1, %v68_v31, -inf }
 0x10b   :  { %v754_v55 = vmax.f32 %v752_v40, %v753_v46  ;;  %v475_v56 = vpop.f32.mrf.mxu0  ;;  %v1107_v12 = vunpack.c.l.b16 %v1043_v63  ;;  %108 = vmax.xlane.f32.xlu0 %v107_v39 }
 0x10c   :  { %v757_v57 = vsel %vm644_vm3, %v628_v51, -inf  ;;  %v531_v0 = vadd.f32 %v2802_v16, %v475_v56  ;;  %v67_v56 = vunpack.c.l.bf16 %v35_v49 }
 0x10d   :  { %v755_v3 = vrot.slane %v754_v55, 1  ;;  %v758_v4 = vrot.slane %v757_v57, 4  ;;  %v1144_v35 = vsel %vm1135_vm9, %v1107_v12, %v1143_v21 }
 0x10e   :  { %v563_v7 = vmax.f32 %v531_v0, 0.0  ;;  %171 = vmax.xlane.f32.xlu1 %v170_v19  ;;  %v104_v0 = vsel %vm97_vm1, %v67_v56, -inf  ;;  %v841_v19 = vsel %vm644_vm3, %v2895_v43, -inf }
 0x10f   :  { %v756_v9 = vmax.f32 %v754_v55, %v755_v3  ;;  %v759_v10 = vmax.f32 %v757_v57, %v758_v4  ;;  %102 = vmax.xlane.f32.xlu2 %v101_v42  ;;  %v69_v55 = vunpack.c.h.bf16 %v36_v23  ;;  %v842_v49 = vrot.slane %v841_v19, 4 }
 0x110   :  { %v596_v13 = vmul.f32 %v2808_v20, %v563_v7 }
 0x111   :  { %v1044_v15 = vpack.c.bf16 %v756_v9, %v756_v9  ;;  %v760_v17 = vrot.slane %v759_v10, 2  ;;  %v110_v57 = vsel %vm97_vm1, %v69_v55, -inf  ;;  %v843_v56 = vmax.f32 %v841_v19, %v842_v49 }
 0x112   :  { %v629_v18 = vadd.f32 %v2810_v22, %v596_v13 }
 0x113   :  { %v1108_v27 = vunpack.c.l.b16 %v1044_v15  ;;  %v761_v28 = vmax.f32 %v759_v10, %v760_v17  ;;  %v478_v29 = vpop.f32.mrf.mxu0  ;;  %v3044_v30 = vpop.f32.mrf.mxu1  ;;  %111 = vmax.xlane.f32.xlu0 %v110_v57  ;;  %v855_v57 = vsel %vm644_vm3, %v2935_v24, -inf }
 0x114   :  { %v764_v33 = vsel %vm644_vm3, %v629_v18, -inf  ;;  %v880_v34 = vpack.c.bf16 %v629_v18, %v628_v51  ;;  %v532_v40 = vadd.f32 %v2802_v16, %v478_v29 }
 0x115   :  { %v765_v37 = vrot.slane %v764_v33, 4  ;;  %v1145_v38 = vsel %vm3994_vm10, %v1108_v27, %v1144_v35  ;;  %v762_v44 = vrot.slane %v761_v28, 1 }
 0x116   :  { %2638 = vmatmul.msk.bf16.gmra.mxu1 %vm644_vm3, %v880_v34  ;;  %v1160_v41 = vpack.c.b16 %v1145_v38, %v2969_v54  ;;  %v564_v47 = vmax.f32 %v532_v40, 0.0  ;;  %v38_v54 = vld [vmem:[%s3971_s0 + $0x14] sm:$0xf]  ;;  %v828_v38 = vrot.slane %v827_v36, 4 }
 0x117   :  { %v766_v45 = vmax.f32 %v764_v33, %v765_v37  ;;  %v763_v50 = vmax.f32 %v761_v28, %v762_v44  ;;  %v70_v62 = vunpack.c.l.bf16 %v38_v54  ;;  %105 = vmax.xlane.f32.xlu2 %v104_v0  ;;  %v834_v37 = vsel %vm644_vm3, %v2869_v1, -inf }
 0x118   :  { %2646 = vmatmul.msk.bf16.vlgmr.msra.gmra.mxu2 %vm644_vm3, %v1160_v41  ;;  %v597_v58 = vmul.f32 %v2808_v20, %v564_v47  ;;  %v835_v42 = vrot.slane %v834_v37, 4 }
 0x119   :  { %v767_v46 = vrot.slane %v766_v45, 2  ;;  %v113_v3 = vsel %vm97_vm1, %v70_v62, -inf  ;;  %v1045_v4 = vpack.c.bf16 %v763_v50, %v763_v50 }
 0x11a   :  { %114 = vmax.xlane.f32.xlu1 %v113_v3  ;;  %v630_v8 = vadd.f32 %v2810_v22, %v597_v58  ;;  %v836_v1 = vmax.f32 %v834_v37, %v835_v42 }
 0x11b   :  { %v768_v51 = vmax.f32 %v766_v45, %v767_v46  ;;  %v480_v52 = vpop.f32.mrf.mxu0  ;;  %v3063_v53 = vpop.f32.mrf.mxu1  ;;  %v1109_v26 = vunpack.c.l.b16 %v1045_v4  ;;  %v829_v45 = vmax.f32 %v827_v36, %v828_v38  ;;  %v848_v46 = vsel %vm644_vm3, %v2902_v48, -inf }
 0x11c   :  { %v533_v60 = vadd.f32 %v2802_v16, %v480_v52  ;;  %v849_v50 = vrot.slane %v848_v46, 4  ;;  %v771_v52 = vsel %vm644_vm3, %v630_v8, -inf }
 0x11d   :  { %v769_v63 = vrot.slane %v768_v51, 1  ;;  %v772_v3 = vrot.slane %v771_v52, 4 }
 0x11e   :  { %v565_v2 = vmax.f32 %v533_v60, 0.0 }
 0x11f   :  { %v770_v5 = vmax.f32 %v768_v51, %v769_v63  ;;  %v830_v51 = vrot.slane %v829_v45, 2  ;;  %v837_v63 = vrot.slane %v836_v1, 2 }
 0x120   :  { %v598_v6 = vmul.f32 %v2808_v20, %v565_v2  ;;  %v850_v2 = vmax.f32 %v848_v46, %v849_v50 }
 0x121   :  { %v1046_v7 = vpack.c.bf16 %v770_v5, %v770_v5  ;;  %v831_v5 = vmax.f32 %v829_v45, %v830_v51 }
 0x122   :  { %v631_v59 = vadd.f32 %v2810_v22, %v598_v6 }
 0x123   :  { %v1110_v9 = vunpack.c.l.b16 %v1046_v7  ;;  %v483_v10 = vpop.f32.mrf.mxu0  ;;  %v3073_v11 = vpop.f32.mrf.mxu1 }
 0x124   :  { %v881_v12 = vpack.c.bf16 %v631_v59, %v630_v8  ;;  %v534_v14 = vadd.f32 %v2802_v16, %v483_v10  ;;  %v778_v60 = vsel %vm644_vm3, %v631_v59, -inf  ;;  %v844_v59 = vrot.slane %v843_v56, 2 }
 0x125   :  { %v3076_v13 = vsel %vm1125_vm4, %v1110_v9, %v1109_v26  ;;  %v779_v6 = vrot.slane %v778_v60, 4  ;;  %v856_v26 = vrot.slane %v855_v57, 4  ;;  %v862_v9 = vsel %vm644_vm3, %v2938_v25, -inf }
 0x126   :  { %2639 = vmatmul.msk.bf16.gmra.mxu1 %vm644_vm3, %v881_v12  ;;  %v566_v15 = vmax.f32 %v534_v14, 0.0  ;;  %v838_v10 = vmax.f32 %v836_v1, %v837_v63 }
 0x128   :  { %v599_v23 = vmul.f32 %v2808_v20, %v566_v15  ;;  %v839_v38 = vrot.slane %v838_v10, 1 }
 0x12a   :  { %v632_v29 = vadd.f32 %v2810_v22, %v599_v23 }
 0x12b   :  { %v485_v17 = vpop.f32.mrf.mxu0  ;;  %v3080_v18 = vpop.f32.mrf.mxu1 }
 0x12c   :  { %v535_v21 = vadd.f32 %v2802_v16, %v485_v17  ;;  %v785_v4 = vsel %vm644_vm3, %v632_v29, -inf  ;;  %v851_v17 = vrot.slane %v850_v2, 2 }
 0x12d   :  { %v786_v12 = vrot.slane %v785_v4, 4 }
 0x12e   :  { %v567_v27 = vmax.f32 %v535_v21, 0.0  ;;  %v773_v21 = vmax.f32 %v771_v52, %v772_v3  ;;  %v852_v19 = vmax.f32 %v850_v2, %v851_v17 }
 0x130   :  { %v600_v28 = vmul.f32 %v2808_v20, %v567_v27  ;;  %v863_v27 = vrot.slane %v862_v9, 4  ;;  %v853_v63 = vrot.slane %v852_v19, 1 }
 0x132   :  { %v633_v31 = vadd.f32 %v2810_v22, %v600_v28  ;;  %v780_v28 = vmax.f32 %v778_v60, %v779_v6 }
 0x133   :  { %v488_v32 = vpop.f32.mrf.mxu0  ;;  %v3087_v33 = vpop.f32.mrf.mxu1 }
 0x134   :  { %v882_v34 = vpack.c.bf16 %v633_v31, %v632_v29  ;;  %v536_v35 = vadd.f32 %v2802_v16, %v488_v32  ;;  %v792_v7 = vsel %vm644_vm3, %v633_v31, -inf  ;;  %v832_v32 = vrot.slane %v831_v5, 1 }
 0x135   :  { %v793_v23 = vrot.slane %v792_v7, 4 }
 0x136   :  { %2640 = vmatmul.msk.bf16.gmra.mxu1 %vm644_vm3, %v882_v34  ;;  %v568_v39 = vmax.f32 %v536_v35, 0.0  ;;  %v845_v34 = vmax.f32 %v843_v56, %v844_v59  ;;  %v857_v35 = vmax.f32 %v855_v57, %v856_v26  ;;  %v3130_v56 = vmax.f32 %v838_v10, %v839_v38 }
 0x137   :  { %v794_v45 = vmax.f32 %v792_v7, %v793_v23 }
 0x138   :  { %v601_v61 = vmul.f32 %v2808_v20, %v568_v39  ;;  %v787_v39 = vmax.f32 %v785_v4, %v786_v12  ;;  %v846_v50 = vrot.slane %v845_v34, 1  ;;  %v858_v51 = vrot.slane %v857_v35, 2 }
 0x139   :  { %v854_v12 = vmax.f32 %v852_v19, %v853_v63 }
 0x13a   :  { %v634_v55 = vadd.f32 %v2810_v22, %v601_v61  ;;  %v864_v61 = vmax.f32 %v862_v9, %v863_v27  ;;  %v788_v60 = vrot.slane %v787_v39, 2  ;;  %v3136_v7 = vmax.f32 %v845_v34, %v846_v50 }
 0x13b   :  { %v490_v40 = vpop.f32.mrf.mxu0  ;;  %v3095_v41 = vpop.f32.mrf.mxu1 }
 0x13c   :  { %v537_v44 = vadd.f32 %v2802_v16, %v490_v40  ;;  %v799_v24 = vsel %vm644_vm3, %v634_v55, -inf  ;;  %v865_v2 = vrot.slane %v864_v61, 2  ;;  %v789_v26 = vmax.f32 %v787_v39, %v788_v60 }
 0x13d   :  { %v800_v29 = vrot.slane %v799_v24, 4  ;;  %v1057_v39 = vpack.c.bf16 %v3136_v7, %v3136_v7 }
 0x13e   :  { %v569_v47 = vmax.f32 %v537_v44, 0.0  ;;  %v774_v44 = vrot.slane %v773_v21, 2 }
 0x13f   :  { %v801_v49 = vmax.f32 %v799_v24, %v800_v29 }
 0x140   :  { %v602_v54 = vmul.f32 %v2808_v20, %v569_v47  ;;  %v781_v47 = vrot.slane %v780_v28, 2  ;;  %v775_v57 = vmax.f32 %v773_v21, %v774_v44  ;;  %v1058_v44 = vpack.c.bf16 %v854_v12, %v854_v12 }
 0x141   :  { %v802_v4 = vrot.slane %v801_v49, 2 }
 0x142   :  { %v635_v43 = vadd.f32 %v2810_v22, %v602_v54  ;;  %v3126_v54 = vpop.xlane.xlu0 %117  ;;  %v782_v3 = vmax.f32 %v780_v28, %v781_v47 }
 0x143   :  { %v493_v62 = vpop.f32.mrf.mxu0  ;;  %v3108_v48 = vpop.f32.mrf.mxu1  ;;  %v803_v27 = vmax.f32 %v801_v49, %v802_v4  ;;  %vm200_vm12 = vcmp.ne.f32.partialorder %v3126_v54, 0.0 }
 0x144   :  { %v538_v0 = vadd.f32 %v2802_v16, %v493_v62  ;;  %v883_v58 = vpack.c.bf16 %v635_v43, %v634_v55  ;;  %v806_v14 = vsel %vm644_vm3, %v635_v43, -inf  ;;  %v3128_v43 = vmax.f32 %v831_v5, %v832_v32  ;;  %v3133_v62 = vpop.xlane.xlu1 %123 }
 0x145   :  { %v807_v25 = vrot.slane %v806_v14, 4  ;;  %v859_v5 = vmax.f32 %v857_v35, %v858_v51  ;;  %v783_v23 = vrot.slane %v782_v3, 1  ;;  %v1056_v35 = vpack.c.bf16 %v3130_v56, %v3130_v56  ;;  %v60_v51 = vld [vmem:[%s3971_s0 + $0x6c] sm:$0xff]   ;;  %v3159_v56 = vpop.xlane.xlu2 %129 }
 0x146   :  { %v570_v8 = vmax.f32 %v538_v0, 0.0  ;;  %2641 = vmatmul.msk.bf16.gmra.mxu1 %vm644_vm3, %v883_v58  ;;  %v795_v0 = vrot.slane %v794_v45, 2  ;;  %v92_v60 = vunpack.c.l.bf16 %v60_v51  ;;  %vm202_vm11 = vcmp.ne.f32.partialorder %v3133_v62, 0.0 }
 0x147   :  { %v808_v52 = vmax.f32 %v806_v14, %v807_v25  ;;  %v776_v14 = vrot.slane %v775_v57, 1  ;;  %v860_v25 = vrot.slane %v859_v5, 1  ;;  %vm204_vm15 = vcmp.ne.f32.partialorder %v3159_v56, 0.0 }
 0x148   :  { %v603_v15 = vmul.f32 %v2808_v20, %v570_v8  ;;  %v179_v4 = vsel %vm97_vm1, %v92_v60, -inf }
 0x149   :  { %v809_v8 = vrot.slane %v808_v52, 2  ;;  %180 = vmax.xlane.f32.xlu0 %v179_v4 }
 0x14a   :  { %v636_v31 = vadd.f32 %v2810_v22, %v603_v15  ;;  %v796_v15 = vmax.f32 %v794_v45, %v795_v0  ;;  %v3150_v38 = vpop.xlane.xlu0 %120 }
 0x14b   :  { %v495_v36 = vpop.f32.mrf.mxu0  ;;  %v3122_v37 = vpop.f32.mrf.mxu1  ;;  %v810_v29 = vmax.f32 %v808_v52, %v809_v8  ;;  %vm201_vm14 = vcmp.ne.f32.partialorder %v3150_v38, 0.0 }
 0x14c   :  { %v813_v40 = vsel %vm644_vm3, %v636_v31, -inf  ;;  %v539_v42 = vadd.f32 %v2802_v16, %v495_v36  ;;  %v790_v36 = vrot.slane %v789_v26, 1  ;;  %v3154_v47 = vpop.xlane.xlu1 %126 }
 0x14d   :  { %v814_v46 = vrot.slane %v813_v40, 4  ;;  %v811_v49 = vrot.slane %v810_v29, 1  ;;  %vm203_vm13 = vcmp.ne.f32.partialorder %v3154_v47, 0.0 }
 0x14e   :  { %v571_v1 = vmax.f32 %v539_v42, 0.0  ;;  %v797_v42 = vrot.slane %v796_v15, 1 }
 0x14f   :  { %v815_v55 = vmax.f32 %v813_v40, %v814_v46  ;;  %v777_v40 = vmax.f32 %v775_v57, %v776_v14  ;;  %v784_v46 = vmax.f32 %v782_v3, %v783_v23  ;;  %v3166_v14 = vpop.f32.mrf.mxu2  ;;  %v1122_v23 = vunpack.c.l.b16 %v1058_v44 }
 0x150   :  { %v604_v16 = vmul.f32 %v2808_v20, %v571_v1  ;;  %v58_v20 = vld [vmem:[%s3971_s0 + $0x64] sm:$0xff]   ;;  %v798_v57 = vmax.f32 %v796_v15, %v797_v42  ;;  %4002 = vst [vmem:[#allocation2_spill] sm:$0xff] %v3166_v14 }
 0x151   :  { %v816_v58 = vrot.slane %v815_v55, 2  ;;  %v90_v10 = vunpack.c.l.bf16 %v58_v20  ;;  %v91_v52 = vunpack.c.h.bf16 %v58_v20  ;;  %v1047_v63 = vpack.c.bf16 %v777_v40, %v777_v40 }
 0x152   :  { %v637_v6 = vadd.f32 %v2810_v22, %v604_v16  ;;  %v866_v22 = vmax.f32 %v864_v61, %v865_v2  ;;  %v804_v61 = vrot.slane %v803_v27, 1  ;;  %v93_v16 = vunpack.c.h.bf16 %v60_v51 }
 0x153   :  { %v817_v59 = vmax.f32 %v815_v55, %v816_v58  ;;  %v3142_v21 = vpop.f32.mrf.mxu1  ;;  %v173_v28 = vsel %vm97_vm1, %v90_v10, -inf  ;;  %v861_v55 = vmax.f32 %v859_v5, %v860_v25  ;;  %v176_v58 = vsel %vm97_vm1, %v91_v52, -inf }
 0x154   :  { %v820_v9 = vsel %vm644_vm3, %v637_v6, -inf  ;;  %v884_v24 = vpack.c.bf16 %v637_v6, %v636_v31  ;;  %174 = vmax.xlane.f32.xlu2 %v173_v28  ;;  %v1055_v31 = vpack.c.bf16 %v3128_v43, %v3128_v43  ;;  %v867_v45 = vrot.slane %v866_v22, 1 }
 0x155   :  { %v821_v17 = vrot.slane %v820_v9, 4  ;;  %v818_v32 = vrot.slane %v817_v59, 1  ;;  %v791_v43 = vmax.f32 %v789_v26, %v790_v36  ;;  %v1048_v2 = vpack.c.bf16 %v784_v46, %v784_v46 }
 0x156   :  { %2642 = vmatmul.msk.bf16.gmra.mxu1 %vm644_vm3, %v884_v24  ;;  %v805_v3 = vmax.f32 %v803_v27, %v804_v61  ;;  %v182_v6 = vsel %vm97_vm1, %v93_v16, -inf  ;;  %v812_v5 = vmax.f32 %v810_v29, %v811_v49  ;;  %v1119_v20 = vunpack.c.l.b16 %v1055_v31  ;;  %v63_v31 = vld [vmem:[%s3971_s0 + $0x78] sm:$0xff]  }
 0x157   :  { %v822_v34 = vmax.f32 %v820_v9, %v821_v17  ;;  %v819_v1 = vmax.f32 %v817_v59, %v818_v32  ;;  %v1120_v26 = vunpack.c.l.b16 %v1056_v35  ;;  %v1049_v9 = vpack.c.bf16 %v791_v43, %v791_v43  ;;  %183 = vmax.xlane.f32.xlu1 %v182_v6  ;;  %v3168_v32 = vpop.xlane.xlu0 %135  ;;  %v62_v35 = vld [vmem:[%s3971_s0 + $0x74] sm:$0xf] }
 0x158   :  { %v1111_v24 = vunpack.c.l.b16 %v1047_v63  ;;  %v1050_v10 = vpack.c.bf16 %v798_v57, %v798_v57  ;;  %v868_v15 = vmax.f32 %v866_v22, %v867_v45  ;;  %v1121_v17 = vunpack.c.l.b16 %v1057_v39  ;;  %v3176_v22 = vpop.xlane.xlu1 %138 }
 0x159   :  { %v823_v19 = vrot.slane %v822_v34, 2  ;;  %v1053_v7 = vpack.c.bf16 %v819_v1, %v819_v1  ;;  %v1051_v27 = vpack.c.bf16 %v805_v3, %v805_v3  ;;  %v1059_v28 = vpack.c.bf16 %v861_v55, %v861_v55 }
 0x15a   :  { %v1052_v36 = vpack.c.bf16 %v812_v5, %v812_v5  ;;  %v1113_v40 = vunpack.c.l.b16 %v1049_v9  ;;  %v95_v39 = vunpack.c.l.bf16 %v63_v31  ;;  %v94_v42 = vunpack.c.l.bf16 %v62_v35 }
 0x15b   :  { %v824_v50 = vmax.f32 %v822_v34, %v823_v19  ;;  %v3164_v59 = vpop.f32.mrf.mxu1  ;;  %v1112_v34 = vunpack.c.l.b16 %v1048_v2  ;;  %v1117_v29 = vunpack.c.l.b16 %v1053_v7  ;;  %v96_v19 = vunpack.c.h.bf16 %v63_v31  ;;  %v3197_v7 = vpop.f32.mrf.mxu2 }
 0x15c   :  { %177 = vmax.xlane.f32.xlu2 %v176_v58  ;;  %v1114_v44 = vunpack.c.l.b16 %v1050_v10  ;;  %v1060_v46 = vpack.c.bf16 %v868_v15, %v868_v15  ;;  %v1147_v61 = vsel %vm1127_vm5, %v1111_v24, %v3076_v13  ;;  %v1115_v49 = vunpack.c.l.b16 %v1051_v27  ;;  %4003 = vst [vmem:[#allocation3_spill] sm:$0xff] %v3197_v7 }
 0x15d   :  { %v825_v0 = vrot.slane %v824_v50, 1  ;;  %v188_v51 = vsel %vm97_vm1, %v95_v39, -inf  ;;  %v185_v52 = vsel %vm97_vm1, %v94_v42, -inf  ;;  %v1116_v55 = vunpack.c.l.b16 %v1052_v36  ;;  %v2690_v42 = vld [vmem:[%s3975_s6] sm:$0xff] }
 0x15e   :  { %v1148_v43 = vsel %vm1129_vm6, %v1112_v34, %v1147_v61  ;;  %189 = vmax.xlane.f32.xlu0 %v188_v51  ;;  %v191_v16 = vsel %vm97_vm1, %v96_v19, -inf  ;;  %v1123_v63 = vunpack.c.l.b16 %v1059_v28  ;;  %v1124_v58 = vunpack.c.l.b16 %v1060_v46  ;;  %1788 = vmatpush.bf16.msrb.mxu2 %v2690_v42  ;;  %v871_v61 = vld [vmem:[%s3976_s5] sm:$0x7] }
 0x15f   :  { %v826_v8 = vmax.f32 %v824_v50, %v825_v0  ;;  %v3182_v50 = vpop.xlane.xlu2 %132  ;;  %v1149_v13 = vsel %vm1131_vm7, %v1113_v40, %v1148_v43  ;;  %192 = vmax.xlane.f32.xlu1 %v191_v16  ;;  %2694 = vmatpush.bf16.msra.mxu3 %v2690_v42  ;;  %vm207_vm0 = vcmp.ne.f32.partialorder %v3176_v22, 0.0 }
 0x160   :  { %v1150_v2 = vsel %vm1133_vm8, %v1114_v44, %v1149_v13  ;;  %v3204_v9 = vpop.xlane.xlu1 %147 }
 0x161   :  { %v1054_v12 = vpack.c.bf16 %v826_v8, %v826_v8  ;;  %v1151_v4 = vsel %vm1135_vm9, %v1115_v49, %v1150_v2 }
 0x162   :  { %v1152_v8 = vsel %vm3994_vm10, %v1116_v55, %v1151_v4 }
 0x163   :  { %v1118_v25 = vunpack.c.l.b16 %v1054_v12  ;;  %v3191_v0 = vpop.f32.mrf.mxu1  ;;  %v3210_v12 = vpop.f32.mrf.mxu2 }
 0x164   :  { %186 = vmax.xlane.f32.xlu2 %v185_v52  ;;  %4004 = vst [vmem:[#allocation4_spill] sm:$0xff] %v3210_v12  ;;  %v3273_v52 = vperm.slane %v871_v61, 0 }
 0x165   :  { %v1153_v45 = vsel %vm1125_vm4, %v1118_v25, %v1117_v29 }
 0x166   :  { %v1154_v1 = vsel %vm1127_vm5, %v1119_v20, %v1153_v45 }
 0x167   :  { %v1155_v60 = vsel %vm1129_vm6, %v1120_v26, %v1154_v1  ;;  %v3201_v26 = vpop.xlane.xlu0 %144  ;;  %v3206_v24 = vpop.xlane.xlu2 %141  ;;  %v3980_v1 = vmov 0.0  }
 0x168   :  { %v1156_v57 = vsel %vm1131_vm7, %v1121_v17, %v1155_v60  ;;  %v3214_v17 = vpop.xlane.xlu1 %156  ;;  %v3253_v62 = vsel %vm202_vm11, 1.0, %v3980_v1  ;;  %v3256_v54 = vsel %vm200_vm12, 1.0, %v3980_v1  ;;  %v3259_v38 = vsel %vm203_vm13, 1.0, %v3980_v1 }
 0x169   :  { %v1157_v3 = vsel %vm1133_vm8, %v1122_v23, %v1156_v57  ;;  %4007 = vst [vmem:[#allocation7_spill] sm:$0xff] %v3253_v62  ;;  %v3262_v47 = vsel %vm201_vm14, 1.0, %v3980_v1  ;;  %v3265_v56 = vsel %vm204_vm15, 1.0, %v3980_v1  ;;  %v3268_v22 = vsel %vm207_vm0, 1.0, %v3980_v1 }
 0x16a   :  { %v1158_v6 = vsel %vm1135_vm9, %v1123_v63, %v1157_v3  ;;  %4008 = vst [vmem:[#allocation8_spill] sm:$0xff] %v3256_v54  ;;  %v3277_v60 = vperm.slane %v871_v61, 1  ;;  %vm206_vm14 = vcmp.ne.f32.partialorder %v3168_v32, 0.0  ;;  %vm209_vm15 = vcmp.ne.f32.partialorder %v3201_v26, 0.0 }
 0x16b   :  { %v1159_v5 = vsel %vm3994_vm10, %v1124_v58, %v1158_v6  ;;  %v3208_v10 = vpop.f32.mrf.mxu1  ;;  %v3220_v28 = vpop.f32.mrf.mxu2  ;;  %4009 = vst [vmem:[#allocation9_spill] sm:$0xff] %v3259_v38  ;;  %vm208_vm0 = vcmp.ne.f32.partialorder %v3206_v24, 0.0 }
 0x16c   :  { %v1161_v20 = vpack.c.b16 %v1159_v5, %v1152_v8  ;;  %4005 = vst [vmem:[#allocation5_spill] sm:$0xff] %v3220_v28 }
 0x16d   :  { %4010 = vst [vmem:[#allocation10_spill] sm:$0xff] %v3262_v47 }
 0x16e   :  { %2647 = vmatmul.msk.bf16.gmra.mxu2 %vm644_vm3, %v1161_v20  ;;  %4011 = vst [vmem:[#allocation11_spill] sm:$0xff] %v3265_v56 }
 0x16f   :  { %v3212_v15 = vpop.xlane.xlu0 %153  ;;  %v3216_v23 = vpop.xlane.xlu2 %150  ;;  %4012 = vst [vmem:[#allocation12_spill] sm:$0xff] %v3268_v22 }
 0x170   :  { %v100_v29 = vpop.xlane.xlu1 %99 }
 0x171   :  { %vm194_vm1 = vcmp.ne.f32.partialorder %v100_v29, 0.0 }
 0x172   :  { %v3271_v51 = vsel %vm194_vm1, 1.0, %v3980_v1  ;;  %vm1481_vm1 = vcmask 130048  }
 0x173   :  { %v3218_v27 = vpop.f32.mrf.mxu1  ;;  %v3228_v31 = vpop.f32.mrf.mxu2 }
 0x177   :  { %v3222_v34 = vpop.xlane.xlu0 %162 }
 0x179   :  { %v3232_v40 = vpop.xlane.xlu1 %168 }
 0x17a   :  { %v3224_v25 = vpop.xlane.xlu2 %159 }
 0x17b   :  { %v3226_v36 = vpop.f32.mrf.mxu1  ;;  %v3239_v44 = vpop.f32.mrf.mxu2 }
 0x17c   :  { %4006 = vst [vmem:[#allocation6_spill] sm:$0xff] %v3239_v44 }
 0x17f   :  { %v3230_v35 = vpop.xlane.xlu0 %165 }
 0x181   :  { %v3245_v46 = vpop.xlane.xlu1 %171 }
 0x182   :  { %v103_v39 = vpop.xlane.xlu2 %102 }
 0x183   :  { %v3237_v19 = vpop.f32.mrf.mxu1  ;;  %vm195_vm3 = vcmp.ne.f32.partialorder %v103_v39, 0.0 }
 0x184   :  { %v3280_v6 = vsel %vm195_vm3, 1.0, %v3980_v1  ;;  %vm210_vm3 = vcmp.ne.f32.partialorder %v3204_v9, 0.0 }
 0x187   :  { %v109_v45 = vpop.xlane.xlu0 %108 }
 0x188   :  { %vm197_vm2 = vcmp.ne.f32.partialorder %v109_v45, 0.0 }
 0x18a   :  { %v106_v49 = vpop.xlane.xlu2 %105 }
 0x18b   :  { %v3275_v55 = vpop.f32.mrf.mxu1  ;;  %vm196_vm11 = vcmp.ne.f32.partialorder %v106_v49, 0.0 }
 0x18c   :  { %v3284_v39 = vsel %vm196_vm11, 1.0, %v3980_v1  ;;  %vm213_vm11 = vcmp.ne.f32.partialorder %v3214_v17, 0.0 }
 0x18f   :  { %v112_v20 = vpop.xlane.xlu0 %111 }
 0x190   :  { %vm198_vm12 = vcmp.ne.f32.partialorder %v112_v20, 0.0 }
 0x19b   :  { %v1180_v43 = vpop.f32.mrf.mxu2 }
 0x19c   :  { %v1194_v16 = vrot.slane %v1180_v43, 1  ;;  %v1222_v63 = vperm.slane %v1180_v43, 0  ;;  %v1197_v13 = vrot.slane %v1180_v43, 4  ;;  %v1195_v57 = vrot.slane %v1180_v43, 2 }
 0x19d   :  { %v1198_v58 = vrot.slane %v1180_v43, 5  ;;  %v1199_v2 = vrot.slane %v1180_v43, 6  ;;  %v1200_v3 = vrot.slane %v1180_v43, 7  ;;  %v1196_v4 = vrot.slane %v1180_v43, 3  ;;  %v115_v43 = vpop.xlane.xlu1 %114 }
 0x19e   :  { %v1223_v8 = vperm.slane %v1194_v16, 0  ;;  %v1286_v5 = vadd.f32 %v1222_v63, %v3044_v30  ;;  %v1224_v29 = vperm.slane %v1195_v57, 0  ;;  %v1226_v7 = vperm.slane %v1197_v13, 0 }
 0x19f   :  { %v1228_v42 = vperm.slane %v1199_v2, 0  ;;  %v1229_v49 = vperm.slane %v1200_v3, 0  ;;  %v1225_v44 = vperm.slane %v1196_v4, 0  ;;  %v1227_v16 = vperm.slane %v1198_v58, 0 }
 0x1a0   :  { %v1287_v12 = vadd.f32 %v1223_v8, %v3063_v53  ;;  %v1288_v14 = vadd.f32 %v1224_v29, %v3073_v11  ;;  %v1318_v28 = vmul.f32 %v3271_v51, %v1286_v5  ;;  %v3297_v11 = vsel %vm197_vm2, 1.0, %v3980_v1 }
 0x1a1   :  { %v1292_v30 = vadd.f32 %v1228_v42, %v3108_v48  ;;  %v1293_v63 = vadd.f32 %v1229_v49, %v3122_v37  ;;  %v1289_v53 = vadd.f32 %v1225_v44, %v3080_v18  ;;  %vm199_vm13 = vcmp.ne.f32.partialorder %v115_v43, 0.0  ;;  %v3311_v18 = vpop.f32.mrf.mxu1 }
 0x1a2   :  { %v1320_v57 = vmul.f32 %v3284_v39, %v1288_v14  ;;  %v1319_v2 = vmul.f32 %v3280_v6, %v1287_v12  ;;  %v1351_v3 = vadd.f32 %v3273_v52, %v1318_v28  ;;  %v3304_v37 = vsel %vm198_vm12, 1.0, %v3980_v1 }
 0x1a3   :  { %v3299_v13 = vpop.f32.mrf.mxu2  ;;  %v1324_v58 = vmul.f32 %v3256_v54, %v1292_v30  ;;  %v1325_v48 = vmul.f32 %v3262_v47, %v1293_v63  ;;  %4013 = vst [vmem:[#allocation13_spill] sm:$0xff] %v3304_v37  ;;  %v1290_v14 = vadd.f32 %v1226_v7, %v3087_v33  ;;  %v3308_v28 = vperm.slane %v871_v61, 2 }
 0x1a4   :  { %v1353_v12 = vadd.f32 %v3273_v52, %v1320_v57  ;;  %v1291_v44 = vadd.f32 %v1227_v16, %v3095_v41  ;;  %v1352_v45 = vadd.f32 %v3273_v52, %v1319_v2  ;;  %v1383_v4 = vmax.f32 %v1351_v3, 0.0 }
 0x1a5   :  { %v1357_v8 = vadd.f32 %v3273_v52, %v1324_v58  ;;  %v3317_v20 = vsel %vm199_vm13, 1.0, %v3980_v1  ;;  %v1206_v33 = vrot.slane %v3299_v13, 6  ;;  %v1321_v7 = vmul.f32 %v3297_v11, %v1289_v53 }
 0x1a6   :  { %v1385_v5 = vmax.f32 %v1353_v12, 0.0  ;;  %4014 = vst [vmem:[#allocation14_spill] sm:$0xff] %v3317_v20  ;;  %v1384_v61 = vmax.f32 %v1352_v45, 0.0  ;;  %v1416_v29 = vmul.f32 %v3277_v60, %v1383_v4  ;;  %v1358_v41 = vadd.f32 %v3273_v52, %v1325_v48 }
 0x1a7   :  { %v1322_v42 = vmul.f32 %v3304_v37, %v1290_v14  ;;  %v1323_v43 = vmul.f32 %v3317_v20, %v1291_v44  ;;  %v1389_v63 = vmax.f32 %v1357_v8, 0.0  ;;  %v1207_v57 = vrot.slane %v3299_v13, 7 }
 0x1a8   :  { %v1418_v49 = vmul.f32 %v3277_v60, %v1385_v5  ;;  %v1417_v16 = vmul.f32 %v3277_v60, %v1384_v61  ;;  %v1449_v30 = vadd.f32 %v3308_v28, %v1416_v29  ;;  %v1236_v2 = vperm.slane %v1206_v33, 0 }
 0x1a9   :  { %v1390_v3 = vmax.f32 %v1358_v41, 0.0  ;;  %v1354_v53 = vadd.f32 %v3273_v52, %v1321_v7  ;;  %v1422_v14 = vmul.f32 %v3277_v60, %v1389_v63  ;;  %v3341_v44 = vsel %vm208_vm0, 1.0, %v3980_v1  ;;  %v3348_v63 = vpop.f32.mrf.mxu1 }
 0x1aa   :  { %v1450_v58 = vadd.f32 %v3308_v28, %v1417_v16  ;;  %v1482_v48 = vsel %vm1481_vm1, %v1449_v30, -inf  ;;  %v3336_v12 = vadd.f32 %v3308_v28, %v1418_v49  ;;  %4015 = vst [vmem:[#allocation15_spill] sm:$0xff] %v3341_v44  ;;  %v1355_v45 = vadd.f32 %v3273_v52, %v1322_v42 }
 0x1ab   :  { %v1483_v4 = vrot.slane %v1482_v48, 4  ;;  %v1423_v8 = vmul.f32 %v3277_v60, %v1390_v3  ;;  %v1455_v7 = vadd.f32 %v3308_v28, %v1422_v14  ;;  %v1386_v61 = vmax.f32 %v1354_v53, 0.0 }
 0x1ac   :  { %v1489_v5 = vsel %vm1481_vm1, %v1450_v58, -inf  ;;  %v1711_v33 = vpack.c.bf16 %v1450_v58, %v1449_v30  ;;  %v1237_v29 = vperm.slane %v1207_v57, 0  ;;  %v1300_v41 = vadd.f32 %v1236_v2, %v3237_v19 }
 0x1ad   :  { %v1484_v49 = vmax.f32 %v1482_v48, %v1483_v4  ;;  %v1490_v16 = vrot.slane %v1489_v5, 4  ;;  %v1356_v24 = vadd.f32 %v3273_v52, %v1323_v43  ;;  %v1456_v42 = vadd.f32 %v3308_v28, %v1423_v8 }
 0x1ae   :  { %2652 = vmatmul.msk.bf16.vlgmr.msrb.gmra.mxu2 %vm1481_vm1, %v1711_v33  ;;  %v1419_v3 = vmul.f32 %v3277_v60, %v1386_v61  ;;  %v1496_v30 = vsel %vm1481_vm1, %v3336_v12, -inf  ;;  %v3359_v57 = vsel %vm206_vm14, 1.0, %v3980_v1  ;;  %v1387_v19 = vmax.f32 %v1355_v45, 0.0 }
 0x1af   :  { %4016 = vst [vmem:[#allocation16_spill] sm:$0xff] %v3359_v57  ;;  %v1485_v2 = vrot.slane %v1484_v49, 2  ;;  %v1491_v53 = vmax.f32 %v1489_v5, %v1490_v16  ;;  %v3364_v43 = vsel %vm209_vm15, 1.0, %v3980_v1  ;;  %v1714_v58 = vpack.c.bf16 %v1456_v42, %v1455_v7 }
 0x1b0   :  { %4017 = vst [vmem:[#allocation17_spill] sm:$0xff] %v3364_v43  ;;  %v1452_v48 = vadd.f32 %v3308_v28, %v1419_v3  ;;  %v1497_v14 = vrot.slane %v1496_v30, 4  ;;  %v1301_v4 = vadd.f32 %v1237_v29, %v3275_v55  ;;  %v1332_v8 = vmul.f32 %v3341_v44, %v1300_v41 }
 0x1b1   :  { %v1486_v33 = vmax.f32 %v1484_v49, %v1485_v2  ;;  %v1492_v32 = vrot.slane %v1491_v53, 2  ;;  %vm205_vm2 = vcmp.ne.f32.partialorder %v3182_v50, 0.0  ;;  %v1388_v45 = vmax.f32 %v1356_v24, 0.0  ;;  %2655 = vmatmul.msk.bf16.vlgmr.msra.gmra.mxu3 %vm1481_vm1, %v1714_v58  ;;  %v3382_v37 = vpop.f32.mrf.mxu1 }
 0x1b2   :  { %v1498_v5 = vmax.f32 %v1496_v30, %v1497_v14  ;;  %v1503_v26 = vsel %vm1481_vm1, %v1452_v48, -inf  ;;  %v1201_v61 = vrot.slane %v3299_v13, 1  ;;  %v1420_v16 = vmul.f32 %v3277_v60, %v1387_v19 }
 0x1b3   :  { %v1487_v3 = vrot.slane %v1486_v33, 1  ;;  %v1493_v1 = vmax.f32 %v1491_v53, %v1492_v32  ;;  %v1524_v55 = vsel %vm1481_vm1, %v1455_v7, -inf  ;;  %v1504_v41 = vrot.slane %v1503_v26, 4 }
 0x1b4   :  { %v1499_v29 = vrot.slane %v1498_v5, 2  ;;  %v1230_v49 = vperm.slane %v3299_v13, 0  ;;  %v1231_v2 = vperm.slane %v1201_v61, 0  ;;  %v1333_v24 = vmul.f32 %v3364_v43, %v1301_v4 }
 0x1b5   :  { %v1365_v58 = vadd.f32 %v3273_v52, %v1332_v8  ;;  %v1488_v30 = vmax.f32 %v1486_v33, %v1487_v3  ;;  %v1494_v14 = vrot.slane %v1493_v1, 1  ;;  %v1505_v47 = vmax.f32 %v1503_v26, %v1504_v41 }
 0x1b6   :  { %v1500_v44 = vmax.f32 %v1498_v5, %v1499_v29  ;;  %v1294_v54 = vadd.f32 %v1230_v49, %v3142_v21  ;;  %v1295_v19 = vadd.f32 %v1231_v2, %v3164_v59  ;;  %v1421_v53 = vmul.f32 %v3277_v60, %v1388_v45 }
 0x1b7   :  { %v1495_v7 = vmax.f32 %v1493_v1, %v1494_v14  ;;  %v1525_v32 = vrot.slane %v1524_v55, 4  ;;  %v1531_v20 = vsel %vm1481_vm1, %v1456_v42, -inf  ;;  %v1506_v4 = vrot.slane %v1505_v47, 2 }
 0x1b8   :  { %v1501_v61 = vrot.slane %v1500_v44, 1  ;;  %v1326_v8 = vmul.f32 %v3253_v62, %v1294_v54  ;;  %v1327_v33 = vmul.f32 %v3259_v38, %v1295_v19  ;;  %v3387_v5 = vadd.f32 %v3273_v52, %v1333_v24 }
 0x1b9   :  { %v1397_v21 = vmax.f32 %v1365_v58, 0.0  ;;  %v1870_v26 = vpack.c.bf16 %v1488_v30, %v1488_v30  ;;  %v1871_v59 = vpack.c.bf16 %v1495_v7, %v1495_v7  ;;  %v1507_v45 = vmax.f32 %v1505_v47, %v1506_v4 }
 0x1ba   :  { %v1502_v3 = vmax.f32 %v1500_v44, %v1501_v61  ;;  %v1359_v1 = vadd.f32 %v3273_v52, %v1326_v8  ;;  %v1360_v42 = vadd.f32 %v3273_v52, %v1327_v33  ;;  %v3391_v29 = vmax.f32 %v1524_v55, %v1525_v32 }
 0x1bb   :  { %v1532_v41 = vrot.slane %v1531_v20, 4  ;;  %v1712_v49 = vpack.c.bf16 %v1452_v48, %v3336_v12  ;;  %v3395_v54 = vadd.f32 %v3308_v28, %v1420_v16  ;;  %v1935_v2 = vunpack.c.l.b16 %v1871_v59 }
 0x1bc   :  { %v1508_v24 = vrot.slane %v1507_v45, 1  ;;  %v1391_v14 = vmax.f32 %v1359_v1, 0.0  ;;  %v1392_v58 = vmax.f32 %v1360_v42, 0.0  ;;  %v4018_v30 = vmov 0.0   ;;  %v3424_v1 = vpop.f32.mrf.mxu1 }
 0x1bd   :  { %v3400_v47 = vsel %vm205_vm2, 1.0, %v4018_v30  ;;  %v3404_v55 = vmul.f32 %v3277_v60, %v1397_v21  ;;  %v3407_v19 = vadd.f32 %v3308_v28, %v1421_v53  ;;  %v1934_v12 = vunpack.c.l.b16 %v1870_v26 }
 0x1be   :  { %4019 = vst [vmem:[#allocation18_spill] sm:$0xff] %v3400_v47  ;;  %2653 = vmatmul.msk.bf16.gmra.mxu2 %vm1481_vm1, %v1712_v49  ;;  %v1872_v48 = vpack.c.bf16 %v1502_v3, %v1502_v3  ;;  %v1424_v16 = vmul.f32 %v3277_v60, %v1391_v14  ;;  %v1425_v7 = vmul.f32 %v3277_v60, %v1392_v58  ;;  %v1510_v61 = vsel %vm1481_vm1, %v3395_v54, -inf }
 0x1bf   :  { %v3413_v32 = vmax.f32 %v1531_v20, %v1532_v41  ;;  %v1517_v4 = vsel %vm1481_vm1, %v3407_v19, -inf  ;;  %v1509_v53 = vmax.f32 %v1507_v45, %v1508_v24  ;;  %v1966_v8 = vsel %vm1125_vm4, %v1935_v2, %v1934_v12 }
 0x1c0   :  { %v1457_v33 = vadd.f32 %v3308_v28, %v1424_v16  ;;  %v1458_v21 = vadd.f32 %v3308_v28, %v1425_v7  ;;  %v1511_v26 = vrot.slane %v1510_v61, 4  ;;  %v1518_v59 = vrot.slane %v1517_v4, 4 }
 0x1c1   :  { %v1202_v3 = vrot.slane %v3299_v13, 2  ;;  %v1203_v20 = vrot.slane %v3299_v13, 3  ;;  %v1936_v42 = vunpack.c.l.b16 %v1872_v48  ;;  %v1713_v12 = vpack.c.bf16 %v3407_v19, %v3395_v54  ;;  %v2691_v48 = vld [vmem:[%s3977_s7] sm:$0xff] }
 0x1c2   :  { %v1538_v41 = vsel %vm1481_vm1, %v1457_v33, -inf  ;;  %v1545_v49 = vsel %vm1481_vm1, %v1458_v21, -inf  ;;  %v1715_v45 = vpack.c.bf16 %v1458_v21, %v1457_v33  ;;  %v1512_v14 = vmax.f32 %v1510_v61, %v1511_v26  ;;  %2015 = vmatpush.bf16.msra.mxu2 %v2691_v48 }
 0x1c3   :  { %v1539_v24 = vrot.slane %v1538_v41, 4  ;;  %v1546_v2 = vrot.slane %v1545_v49, 4  ;;  %v1519_v58 = vmax.f32 %v1517_v4, %v1518_v59  ;;  %v1232_v16 = vperm.slane %v1202_v3, 0 }
 0x1c4   :  { %2656 = vmatmul.msk.bf16.gmra.mxu3 %vm1481_vm1, %v1715_v45  ;;  %v1233_v7 = vperm.slane %v1203_v20, 0  ;;  %v1204_v44 = vrot.slane %v3299_v13, 4  ;;  %v1513_v33 = vrot.slane %v1512_v14, 2  ;;  %v1205_v26 = vrot.slane %v3299_v13, 5 }
 0x1c5   :  { %v1540_v50 = vmax.f32 %v1538_v41, %v1539_v24  ;;  %v1547_v43 = vmax.f32 %v1545_v49, %v1546_v2  ;;  %v1520_v21 = vrot.slane %v1519_v58, 2  ;;  %v1296_v61 = vadd.f32 %v1232_v16, %v3191_v0 }
 0x1c6   :  { %v1297_v4 = vadd.f32 %v1233_v7, %v3208_v10  ;;  %v1234_v54 = vperm.slane %v1204_v44, 0  ;;  %v1873_v19 = vpack.c.bf16 %v1509_v53, %v1509_v53  ;;  %v1514_v3 = vmax.f32 %v1512_v14, %v1513_v33  ;;  %v3446_v33 = vpop.f32.mrf.mxu1 }
 0x1c7   :  { %v1548_v59 = vrot.slane %v1547_v43, 2  ;;  %v1521_v20 = vmax.f32 %v1519_v58, %v1520_v21  ;;  %v1328_v45 = vmul.f32 %v3265_v56, %v1296_v61  ;;  %v1235_v41 = vperm.slane %v1205_v26, 0 }
 0x1c8   :  { %v1329_v38 = vmul.f32 %v3400_v47, %v1297_v4  ;;  %v1298_v49 = vadd.f32 %v1234_v54, %v3218_v27  ;;  %v1967_v24 = vsel %vm1127_vm5, %v1936_v42, %v1966_v8  ;;  %v1541_v0 = vrot.slane %v1540_v50, 2 }
 0x1c9   :  { %v1515_v2 = vrot.slane %v1514_v3, 1  ;;  %v1522_v10 = vrot.slane %v1521_v20, 1  ;;  %v1361_v16 = vadd.f32 %v3273_v52, %v1328_v45  ;;  %v1299_v44 = vadd.f32 %v1235_v41, %v3226_v36 }
 0x1ca   :  { %v1362_v13 = vadd.f32 %v3273_v52, %v1329_v38  ;;  %v1330_v53 = vmul.f32 %v3359_v57, %v1298_v49  ;;  %v1937_v14 = vunpack.c.l.b16 %v1873_v19  ;;  %v1549_v58 = vmax.f32 %v1547_v43, %v1548_v59 }
 0x1cb   :  { %v1516_v7 = vmax.f32 %v1514_v3, %v1515_v2  ;;  %v1523_v48 = vmax.f32 %v1521_v20, %v1522_v10  ;;  %v1393_v27 = vmax.f32 %v1361_v16, 0.0  ;;  %v1331_v8 = vmul.f32 %v3268_v22, %v1299_v44 }
 0x1cc   :  { %v1394_v21 = vmax.f32 %v1362_v13, 0.0  ;;  %v1363_v42 = vadd.f32 %v3273_v52, %v1330_v53  ;;  %v1968_v61 = vsel %vm1129_vm6, %v1937_v14, %v1967_v24  ;;  %v1542_v4 = vmax.f32 %v1540_v50, %v1541_v0 }
 0x1cd   :  { %v1874_v38 = vpack.c.bf16 %v1516_v7, %v1516_v7  ;;  %v1875_v26 = vpack.c.bf16 %v1523_v48, %v1523_v48  ;;  %v1426_v36 = vmul.f32 %v3277_v60, %v1393_v27  ;;  %v1364_v54 = vadd.f32 %v3273_v52, %v1331_v8 }
 0x1ce   :  { %2654 = vmatmul.msk.bf16.gmra.mxu2 %vm1481_vm1, %v1713_v12  ;;  %v1427_v43 = vmul.f32 %v3277_v60, %v1394_v21  ;;  %v1395_v19 = vmax.f32 %v1363_v42, 0.0  ;;  %v4020_v59 = vrot.slane %v3391_v29, 2  ;;  %v1534_v20 = vrot.slane %v3413_v32, 2 }
 0x1cf   :  { %v1550_v45 = vrot.slane %v1549_v58, 1  ;;  %v1938_v41 = vunpack.c.l.b16 %v1874_v38  ;;  %v1459_v50 = vadd.f32 %v3308_v28, %v1426_v36  ;;  %v1396_v12 = vmax.f32 %v1364_v54, 0.0 }
 0x1d0   :  { %v1528_v3 = vmax.f32 %v3391_v29, %v4020_v59  ;;  %v1460_v49 = vadd.f32 %v3308_v28, %v1427_v43  ;;  %v1428_v24 = vmul.f32 %v3277_v60, %v1395_v19  ;;  %v1543_v0 = vrot.slane %v1542_v4, 1  ;;  %v3488_v43 = vpop.f32.mrf.mxu1 }
 0x1d1   :  { %v1939_v2 = vunpack.c.l.b16 %v1875_v26  ;;  %v1969_v10 = vsel %vm1131_vm7, %v1938_v41, %v1968_v61  ;;  %v4021_v16 = vmax.f32 %v3387_v5, 0.0  ;;  %v1552_v29 = vsel %vm1481_vm1, %v1459_v50, -inf }
 0x1d2   :  { %v1559_v44 = vsel %vm1481_vm1, %v1460_v49, -inf  ;;  %v1716_v53 = vpack.c.bf16 %v1460_v49, %v1459_v50  ;;  %v1429_v14 = vmul.f32 %v3277_v60, %v1396_v12  ;;  %v1551_v7 = vmax.f32 %v1549_v58, %v1550_v45 }
 0x1d3   :  { %v1431_v13 = vmul.f32 %v3277_v60, %v4021_v16  ;;  %v1553_v48 = vrot.slane %v1552_v29, 4  ;;  %v1560_v27 = vrot.slane %v1559_v44, 4  ;;  %v3470_v21 = vadd.f32 %v3308_v28, %v1428_v24 }
 0x1d4   :  { %2657 = vmatmul.msk.bf16.gmra.mxu3 %vm1481_vm1, %v1716_v53  ;;  %v3474_v8 = vadd.f32 %v3308_v28, %v1429_v14  ;;  %v3478_v5 = vadd.f32 %v3308_v28, %v3404_v55  ;;  %v3484_v61 = vsel %vm1133_vm8, %v1939_v2, %v1969_v10  ;;  %v1529_v58 = vrot.slane %v1528_v3, 1 }
 0x1d5   :  { %v3481_v42 = vadd.f32 %v3308_v28, %v1431_v13  ;;  %v1554_v38 = vmax.f32 %v1552_v29, %v1553_v48  ;;  %v1561_v26 = vmax.f32 %v1559_v44, %v1560_v27  ;;  %v1566_v36 = vsel %vm1481_vm1, %v3470_v21, -inf }
 0x1d6   :  { %v1544_v54 = vmax.f32 %v1542_v4, %v1543_v0  ;;  %v1567_v19 = vrot.slane %v1566_v36, 4  ;;  %v1573_v55 = vsel %vm1481_vm1, %v3474_v8, -inf  ;;  %v1580_v59 = vsel %vm1481_vm1, %v3478_v5, -inf }
 0x1d7   :  { %v1555_v45 = vrot.slane %v1554_v38, 2  ;;  %v1562_v41 = vrot.slane %v1561_v26, 2  ;;  %v1574_v50 = vrot.slane %v1573_v55, 4  ;;  %v1581_v49 = vrot.slane %v1580_v59, 4 }
 0x1d8   :  { %v1535_v12 = vmax.f32 %v3413_v32, %v1534_v20  ;;  %v1879_v24 = vpack.c.bf16 %v1551_v7, %v1551_v7  ;;  %v1568_v2 = vmax.f32 %v1566_v36, %v1567_v19  ;;  %v1587_v10 = vsel %vm1481_vm1, %v3481_v42, -inf }
 0x1d9   :  { %v1556_v16 = vmax.f32 %v1554_v38, %v1555_v45  ;;  %v1563_v4 = vmax.f32 %v1561_v26, %v1562_v41  ;;  %v1575_v0 = vmax.f32 %v1573_v55, %v1574_v50  ;;  %v1582_v13 = vmax.f32 %v1580_v59, %v1581_v49  ;;  %v3498_v50 = vpop.f32.mrf.mxu1 }
 0x1da   :  { %v1530_v29 = vmax.f32 %v1528_v3, %v1529_v58  ;;  %v1878_v44 = vpack.c.bf16 %v1544_v54, %v1544_v54  ;;  %v1569_v53 = vrot.slane %v1568_v2, 2  ;;  %v1588_v14 = vrot.slane %v1587_v10, 4 }
 0x1db   :  { %v1557_v48 = vrot.slane %v1556_v16, 1  ;;  %v1564_v27 = vrot.slane %v1563_v4, 1  ;;  %v1576_v22 = vrot.slane %v1575_v0, 2  ;;  %v1583_v57 = vrot.slane %v1582_v13, 2 }
 0x1dc   :  { %v1536_v47 = vrot.slane %v1535_v12, 1  ;;  %v1943_v56 = vunpack.c.l.b16 %v1879_v24  ;;  %v1570_v32 = vmax.f32 %v1568_v2, %v1569_v53  ;;  %v1589_v20 = vmax.f32 %v1587_v10, %v1588_v14 }
 0x1dd   :  { %v1558_v7 = vmax.f32 %v1556_v16, %v1557_v48  ;;  %v1565_v36 = vmax.f32 %v1563_v4, %v1564_v27  ;;  %v1577_v19 = vmax.f32 %v1575_v0, %v1576_v22  ;;  %v1584_v62 = vmax.f32 %v1582_v13, %v1583_v57 }
 0x1de   :  { %v1942_v38 = vunpack.c.l.b16 %v1878_v44  ;;  %v1571_v26 = vrot.slane %v1570_v32, 1  ;;  %v1590_v55 = vrot.slane %v1589_v20, 2  ;;  %v1537_v45 = vmax.f32 %v1535_v12, %v1536_v47  ;;  %v175_v44 = vpop.xlane.xlu2 %174 }
 0x1df   :  { %v1880_v59 = vpack.c.bf16 %v1558_v7, %v1558_v7  ;;  %v1881_v3 = vpack.c.bf16 %v1565_v36, %v1565_v36  ;;  %v1578_v58 = vrot.slane %v1577_v19, 1  ;;  %v1585_v54 = vrot.slane %v1584_v62, 1 }
 0x1e0   :  { %v1973_v41 = vsel %vm1125_vm4, %v1943_v56, %v1942_v38  ;;  %v1572_v49 = vmax.f32 %v1570_v32, %v1571_v26  ;;  %v1591_v24 = vmax.f32 %v1589_v20, %v1590_v55  ;;  %v1876_v2 = vpack.c.bf16 %v1530_v29, %v1530_v29 }
 0x1e1   :  { %v1944_v10 = vunpack.c.l.b16 %v1880_v59  ;;  %v1579_v16 = vmax.f32 %v1577_v19, %v1578_v58  ;;  %v1586_v4 = vmax.f32 %v1584_v62, %v1585_v54  ;;  %v1945_v22 = vunpack.c.l.b16 %v1881_v3  ;;  %v3510_v26 = vpop.f32.mrf.mxu1  ;;  %v181_v58 = vpop.xlane.xlu0 %180 }
 0x1e2   :  { %v1717_v57 = vpack.c.bf16 %v3474_v8, %v3470_v21  ;;  %v1882_v0 = vpack.c.bf16 %v1572_v49, %v1572_v49  ;;  %v1592_v13 = vrot.slane %v1591_v24, 1  ;;  %v1877_v56 = vpack.c.bf16 %v1537_v45, %v1537_v45 }
 0x1e3   :  { %v1974_v53 = vsel %vm1127_vm5, %v1944_v10, %v1973_v41  ;;  %v1883_v47 = vpack.c.bf16 %v1579_v16, %v1579_v16  ;;  %v1884_v12 = vpack.c.bf16 %v1586_v4, %v1586_v4  ;;  %v1940_v27 = vunpack.c.l.b16 %v1876_v2 }
 0x1e4   :  { %v1975_v14 = vsel %vm1129_vm6, %v1945_v22, %v1974_v53  ;;  %2658 = vmatmul.msk.bf16.gmra.mxu3 %vm1481_vm1, %v1717_v57  ;;  %v1946_v29 = vunpack.c.l.b16 %v1882_v0  ;;  %v1593_v48 = vmax.f32 %v1591_v24, %v1592_v13  ;;  %v1941_v36 = vunpack.c.l.b16 %v1877_v56 }
 0x1e5   :  { %v1947_v62 = vunpack.c.l.b16 %v1883_v47  ;;  %v1948_v21 = vunpack.c.l.b16 %v1884_v12  ;;  %v1971_v8 = vsel %vm1135_vm9, %v1940_v27, %v3484_v61  ;;  %v1718_v41 = vpack.c.bf16 %v3481_v42, %v3478_v5  ;;  %v184_v5 = vpop.xlane.xlu1 %183 }
 0x1e6   :  { %v1976_v32 = vsel %vm1131_vm7, %v1946_v29, %v1975_v14  ;;  %v1885_v20 = vpack.c.bf16 %v1593_v48, %v1593_v48  ;;  %v1972_v55 = vsel %vm3994_vm10, %v1941_v36, %v1971_v8  ;;  %v178_v54 = vpop.xlane.xlu2 %177  ;;  %vm212_vm12 = vcmp.ne.f32.partialorder %v3212_v15, 0.0 }
 0x1e7   :  { %v1977_v7 = vsel %vm1133_vm8, %v1947_v62, %v1976_v32  ;;  %vm211_vm13 = vcmp.ne.f32.partialorder %v3216_v23, 0.0  ;;  %vm215_vm14 = vcmp.ne.f32.partialorder %v3222_v34, 0.0  ;;  %vm216_vm15 = vcmp.ne.f32.partialorder %v3230_v35, 0.0 }
 0x1e8   :  { %v1949_v19 = vunpack.c.l.b16 %v1885_v20  ;;  %v1978_v38 = vsel %vm1135_vm9, %v1948_v21, %v1977_v7  ;;  %vm217_vm0 = vcmp.ne.f32.partialorder %v3232_v40, 0.0  ;;  %vm218_vm2 = vcmp.ne.f32.partialorder %v3245_v46, 0.0 }
 0x1e9   :  { %v1009_v49 = vpop.f32.mrf.mxu1  ;;  %v3530_v17 = vsel %vm210_vm3, 1.0, %v4018_v30  ;;  %v3533_v15 = vsel %vm213_vm11, 1.0, %v4018_v30  ;;  %v190_v23 = vpop.xlane.xlu0 %189  ;;  %v3536_v34 = vsel %vm212_vm12, 1.0, %v4018_v30  ;;  %v3539_v35 = vsel %vm211_vm13, 1.0, %v4018_v30 }
 0x1ea   :  { %v1979_v59 = vsel %vm3994_vm10, %v1949_v19, %v1978_v38  ;;  %vm219_vm10 = vcmp.ne.f32.partialorder %v175_v44, 0.0  ;;  %v3542_v40 = vsel %vm215_vm14, 1.0, %v4018_v30  ;;  %v3545_v46 = vsel %vm216_vm15, 1.0, %v4018_v30 }
 0x1eb   :  { %v1994_v3 = vpack.c.b16 %v1979_v59, %v1972_v55  ;;  %v3548_v24 = vsel %vm217_vm0, 1.0, %v4018_v30  ;;  %v3551_v2 = vsel %vm218_vm2, 1.0, %v4018_v30  ;;  %v3554_v10 = vsel %vm219_vm10, 1.0, %v4018_v30  ;;  %v4026_v55 = vld [vmem:[#allocation5_spill] sm:$0xff] }
 0x1ec   :  { %4022 = vst [vmem:[#allocation19_spill] sm:$0xff] %v3551_v2  ;;  %vm221_vm3 = vcmp.ne.f32.partialorder %v181_v58, 0.0  ;;  %vm220_vm11 = vcmp.ne.f32.partialorder %v178_v54, 0.0  ;;  %vm224_vm12 = vcmp.ne.f32.partialorder %v190_v23, 0.0  ;;  %vm214_vm14 = vcmp.ne.f32.partialorder %v3224_v25, 0.0  ;;  %v4029_v23 = vld [vmem:[#allocation3_spill] sm:$0xff] }
 0x1ed   :  { %2672 = vmatmul.msk.bf16.vlgmr.msra.gmra.mxu2 %vm1481_vm1, %v1994_v3  ;;  %v3560_v56 = vsel %vm221_vm3, 1.0, %v4018_v30  ;;  %vm222_vm10 = vcmp.ne.f32.partialorder %v184_v5, 0.0  ;;  %v3564_v20 = vsel %vm224_vm12, 1.0, %v4018_v30  ;;  %v3575_v3 = vsel %vm220_vm11, 1.0, %v4018_v30  ;;  %v4032_v5 = vld [vmem:[#allocation6_spill] sm:$0xff] }
 0x1ee   :  { %v187_v42 = vpop.xlane.xlu2 %186  ;;  %4023 = vst [vmem:[#allocation20_spill] sm:$0xff] %v3560_v56  ;;  %v3585_v54 = vsel %vm222_vm10, 1.0, %v4018_v30  ;;  %vm4036_vm0 = vcmask 1047559  }
 0x1ef   :  { %vm223_vm13 = vcmp.ne.f32.partialorder %v187_v42, 0.0  ;;  %4024 = vst [vmem:[#allocation21_spill] sm:$0xff] %v3564_v20  ;;  %vm4037_vm2 = vmmov %vm4036_vm0 }
 0x1f0   :  { %v3568_v21 = vsel %vm223_vm13, 1.0, %v4018_v30  ;;  %4027 = vst [vmem:[#allocation5_spill] sm:$0xff] %v3575_v3  ;;  %vm4051_vm3 = vmmov %vm4036_vm0 }
 0x1f1   :  { %v3515_v45 = vpop.f32.mrf.mxu2  ;;  %4025 = vst [vmem:[#allocation22_spill] sm:$0xff] %v3568_v21  ;;  %v1011_v7 = vpop.f32.mrf.mxu1  ;;  %vm4052_vm11 = vmmov %vm4036_vm0 }
 0x1f2   :  { %v1213_v61 = vrot.slane %v3515_v45, 6  ;;  %v1214_v16 = vrot.slane %v3515_v45, 7  ;;  %vm4060_vm12 = vmmov %vm4036_vm0 }
 0x1f4   :  { %2659 = vmatmul.msk.bf16.gmra.mxu3 %vm1481_vm1, %v1718_v41  ;;  %v1244_v9 = vperm.slane %v1213_v61, 0  ;;  %v1245_v32 = vperm.slane %v1214_v16, 0  ;;  %v4028_v61 = vld [vmem:[#allocation2_spill] sm:$0xff]  ;;  %v4030_v16 = vld [vmem:[#allocation4_spill] sm:$0xff] }
 0x1f5   :  { %4031 = vst [vmem:[#allocation2_spill] sm:$0xff] %v3585_v54 }
 0x1f6   :  { %v1308_v4 = vadd.f32 %v1244_v9, %v3498_v50 }
 0x1f8   :  { %v1340_v36 = vmul.f32 %v3545_v46, %v1308_v4  ;;  %v193_v4 = vpop.xlane.xlu1 %192 }
 0x1f9   :  { %v1187_v22 = vpop.f32.mrf.mxu2  ;;  %vm225_vm15 = vcmp.ne.f32.partialorder %v193_v4, 0.0 }
 0x1fa   :  { %v1215_v57 = vrot.slane %v1187_v22, 1  ;;  %v1216_v0 = vrot.slane %v1187_v22, 2  ;;  %v1217_v13 = vrot.slane %v1187_v22, 3  ;;  %v1218_v44 = vrot.slane %v1187_v22, 4 }
 0x1fb   :  { %v1246_v53 = vperm.slane %v1187_v22, 0  ;;  %v1220_v47 = vrot.slane %v1187_v22, 6  ;;  %v1219_v12 = vrot.slane %v1187_v22, 5  ;;  %v1221_v8 = vrot.slane %v1187_v22, 7 }
 0x1fc   :  { %v1247_v14 = vperm.slane %v1215_v57, 0  ;;  %v1248_v29 = vperm.slane %v1216_v0, 0  ;;  %v1249_v50 = vperm.slane %v1217_v13, 0  ;;  %v1250_v48 = vperm.slane %v1218_v44, 0 }
 0x1fd   :  { %v1252_v27 = vperm.slane %v1220_v47, 0  ;;  %v1251_v62 = vperm.slane %v1219_v12, 0  ;;  %v1310_v19 = vadd.f32 %v1246_v53, %v1009_v49  ;;  %v1253_v9 = vperm.slane %v1221_v8, 0 }
 0x1fe   :  { %v1311_v58 = vadd.f32 %v1247_v14, %v1011_v7  ;;  %v1312_v41 = vadd.f32 %v1248_v29, %v4028_v61  ;;  %v1313_v42 = vadd.f32 %v1249_v50, %v4029_v23  ;;  %v1314_v22 = vadd.f32 %v1250_v48, %v4030_v16 }
 0x1ff   :  { %v1316_v38 = vadd.f32 %v1252_v27, %v3228_v31  ;;  %v1315_v59 = vadd.f32 %v1251_v62, %v4026_v55  ;;  %v1309_v31 = vadd.f32 %v1245_v32, %v3510_v26  ;;  %v1208_v0 = vrot.slane %v3515_v45, 1 }
 0x200   :  { %v1238_v13 = vperm.slane %v3515_v45, 0  ;;  %v3590_v44 = vadd.f32 %v3273_v52, %v1340_v36  ;;  %v1342_v53 = vmul.f32 %v3551_v2, %v1310_v19  ;;  %v1343_v14 = vmul.f32 %v3554_v10, %v1311_v58 }
 0x201   :  { %v1348_v57 = vmul.f32 %v3564_v20, %v1316_v38  ;;  %v1347_v49 = vmul.f32 %v3568_v21, %v1315_v59  ;;  %v1344_v26 = vmul.f32 %v3575_v3, %v1312_v41  ;;  %v1317_v29 = vadd.f32 %v1253_v9, %v4032_v5 }
 0x202   :  { %v1345_v50 = vmul.f32 %v3560_v56, %v1313_v42  ;;  %v1346_v48 = vmul.f32 %v3585_v54, %v1314_v22  ;;  %v3603_v32 = vsel %vm214_vm14, 1.0, %v4018_v30  ;;  %v3606_v8 = vmul.f32 %v3548_v24, %v1309_v31 }
 0x203   :  { %v1381_v47 = vadd.f32 %v3273_v52, %v1348_v57  ;;  %v1380_v12 = vadd.f32 %v3273_v52, %v1347_v49  ;;  %v3609_v7 = vsel %vm225_vm15, 1.0, %v4018_v30  ;;  %v1209_v36 = vrot.slane %v3515_v45, 2 }
 0x204   :  { %4033 = vst [vmem:[#allocation3_spill] sm:$0xff] %v3609_v7  ;;  %v1375_v19 = vadd.f32 %v3273_v52, %v1342_v53  ;;  %v1210_v59 = vrot.slane %v3515_v45, 3  ;;  %v1376_v25 = vadd.f32 %v3273_v52, %v1343_v14  ;;  %v1377_v58 = vadd.f32 %v3273_v52, %v1344_v26 }
 0x205   :  { %v1413_v27 = vmax.f32 %v1381_v47, 0.0  ;;  %v1412_v62 = vmax.f32 %v1380_v12, 0.0  ;;  %v1349_v61 = vmul.f32 %v3609_v7, %v1317_v29  ;;  %v1239_v41 = vperm.slane %v1208_v0, 0 }
 0x206   :  { %v1405_v30 = vmax.f32 %v3590_v44, 0.0  ;;  %v1378_v9 = vadd.f32 %v3273_v52, %v1345_v50  ;;  %v1379_v23 = vadd.f32 %v3273_v52, %v1346_v48  ;;  %v1302_v42 = vadd.f32 %v1238_v13, %v3311_v18 }
 0x207   :  { %v1446_v38 = vmul.f32 %v3277_v60, %v1413_v27  ;;  %v1445_v55 = vmul.f32 %v3277_v60, %v1412_v62  ;;  %v1382_v22 = vadd.f32 %v3273_v52, %v1349_v61  ;;  %v1303_v57 = vadd.f32 %v1239_v41, %v3348_v63 }
 0x208   :  { %v1240_v49 = vperm.slane %v1209_v36, 0  ;;  %v1407_v4 = vmax.f32 %v1375_v19, 0.0  ;;  %v1334_v0 = vmul.f32 %v3530_v17, %v1302_v42  ;;  %v1241_v53 = vperm.slane %v1210_v59, 0 }
 0x209   :  { %v3624_v16 = vadd.f32 %v3308_v28, %v1446_v38  ;;  %v3629_v31 = vadd.f32 %v3308_v28, %v1445_v55  ;;  %v1408_v47 = vmax.f32 %v1376_v25, 0.0  ;;  %v1409_v12 = vmax.f32 %v1377_v58, 0.0 }
 0x20a   :  { %v1414_v14 = vmax.f32 %v1382_v22, 0.0  ;;  %v1335_v18 = vmul.f32 %v3539_v35, %v1303_v57  ;;  %v1410_v13 = vmax.f32 %v1378_v9, 0.0  ;;  %v1367_v26 = vadd.f32 %v3273_v52, %v1334_v0 }
 0x20b   :  { %v1304_v5 = vadd.f32 %v1240_v49, %v3382_v37  ;;  %v1305_v63 = vadd.f32 %v1241_v53, %v3424_v1  ;;  %v1411_v29 = vmax.f32 %v1379_v23, 0.0  ;;  %v1692_v50 = vsel %vm1481_vm1, %v3624_v16, -inf }
 0x20c   :  { %v1447_v48 = vmul.f32 %v3277_v60, %v1414_v14  ;;  %v1368_v27 = vadd.f32 %v3273_v52, %v1335_v18  ;;  %v1685_v62 = vsel %vm1481_vm1, %v3629_v31, -inf  ;;  %v1399_v36 = vmax.f32 %v1367_v26, 0.0 }
 0x20d   :  { %v1336_v19 = vmul.f32 %v3536_v34, %v1304_v5  ;;  %v1337_v38 = vmul.f32 %v3533_v15, %v1305_v63  ;;  %v1440_v37 = vmul.f32 %v3277_v60, %v1407_v4  ;;  %v1211_v59 = vrot.slane %v3515_v45, 4 }
 0x20e   :  { %v3646_v1 = vadd.f32 %v3308_v28, %v1447_v48  ;;  %v1400_v55 = vmax.f32 %v1368_v27, 0.0  ;;  %v1432_v25 = vmul.f32 %v3277_v60, %v1399_v36  ;;  %v1212_v41 = vrot.slane %v3515_v45, 5 }
 0x20f   :  { %v1369_v58 = vadd.f32 %v3273_v52, %v1336_v19  ;;  %v1370_v61 = vadd.f32 %v3273_v52, %v1337_v38  ;;  %v1441_v9 = vmul.f32 %v3277_v60, %v1408_v47  ;;  %v1693_v23 = vrot.slane %v1692_v50, 4 }
 0x210   :  { %v1686_v42 = vrot.slane %v1685_v62, 4  ;;  %v1433_v22 = vmul.f32 %v3277_v60, %v1400_v55  ;;  %v1442_v57 = vmul.f32 %v3277_v60, %v1409_v12  ;;  %v1465_v49 = vadd.f32 %v3308_v28, %v1432_v25 }
 0x211   :  { %v1401_v4 = vmax.f32 %v1369_v58, 0.0  ;;  %v1402_v0 = vmax.f32 %v1370_v61, 0.0  ;;  %v3658_v53 = vmul.f32 %v3277_v60, %v1410_v13  ;;  %v1699_v14 = vsel %vm1481_vm1, %v3646_v1, -inf }
 0x212   :  { %v1466_v45 = vadd.f32 %v3308_v28, %v1433_v22  ;;  %v1242_v18 = vperm.slane %v1211_v59, 0  ;;  %v1594_v47 = vsel %vm1481_vm1, %v1465_v49, -inf  ;;  %v1243_v12 = vperm.slane %v1212_v41, 0 }
 0x213   :  { %v1434_v26 = vmul.f32 %v3277_v60, %v1401_v4  ;;  %v1435_v5 = vmul.f32 %v3277_v60, %v1402_v0  ;;  %v1694_v63 = vmax.f32 %v1692_v50, %v1693_v23  ;;  %v1687_v48 = vmax.f32 %v1685_v62, %v1686_v42 }
 0x214   :  { %v1595_v27 = vrot.slane %v1594_v47, 4  ;;  %v1601_v36 = vsel %vm1481_vm1, %v1466_v45, -inf  ;;  %v1700_v13 = vrot.slane %v1699_v14, 4  ;;  %v1719_v38 = vpack.c.bf16 %v1466_v45, %v1465_v49 }
 0x215   :  { %v1602_v19 = vrot.slane %v1601_v36, 4  ;;  %v3668_v55 = vadd.f32 %v3308_v28, %v1434_v26  ;;  %v3671_v59 = vmul.f32 %v3277_v60, %v1411_v29  ;;  %v3674_v58 = vadd.f32 %v3308_v28, %v1435_v5 }
 0x216   :  { %v1596_v25 = vmax.f32 %v1594_v47, %v1595_v27  ;;  %v1306_v61 = vadd.f32 %v1242_v18, %v3446_v33  ;;  %v3678_v50 = vadd.f32 %v3308_v28, %v1440_v37  ;;  %2660 = vmatmul.msk.bf16.gmra.mxu3 %vm1481_vm1, %v1719_v38  ;;  %v1307_v23 = vadd.f32 %v1243_v12, %v3488_v43 }
 0x217   :  { %v1603_v62 = vmax.f32 %v1601_v36, %v1602_v19  ;;  %v1608_v41 = vsel %vm1481_vm1, %v3668_v55, -inf  ;;  %v1695_v42 = vrot.slane %v1694_v63, 2  ;;  %v1615_v49 = vsel %vm1481_vm1, %v3674_v58, -inf }
 0x218   :  { %v1597_v29 = vrot.slane %v1596_v25, 2  ;;  %v1609_v22 = vrot.slane %v1608_v41, 4  ;;  %v1688_v4 = vrot.slane %v1687_v48, 2  ;;  %v1701_v0 = vmax.f32 %v1699_v14, %v1700_v13 }
 0x219   :  { %v1604_v33 = vrot.slane %v1603_v62, 2  ;;  %v1616_v45 = vrot.slane %v1615_v49, 4  ;;  %v1338_v47 = vmul.f32 %v3603_v32, %v1306_v61  ;;  %v1339_v26 = vmul.f32 %v3542_v40, %v1307_v23 }
 0x21a   :  { %v1598_v37 = vmax.f32 %v1596_v25, %v1597_v29  ;;  %v1610_v18 = vmax.f32 %v1608_v41, %v1609_v22  ;;  %v1374_v43 = vadd.f32 %v3273_v52, %v3606_v8  ;;  %v1438_v12 = vmul.f32 %v3277_v60, %v1405_v30 }
 0x21b   :  { %v1605_v5 = vmax.f32 %v1603_v62, %v1604_v33  ;;  %v1617_v27 = vmax.f32 %v1615_v49, %v1616_v45  ;;  %v3694_v36 = vadd.f32 %v3308_v28, %v1441_v9  ;;  %v1371_v13 = vadd.f32 %v3273_v52, %v1338_v47 }
 0x21c   :  { %v1611_v14 = vrot.slane %v1610_v18, 2  ;;  %v1372_v19 = vadd.f32 %v3273_v52, %v1339_v26  ;;  %v1650_v38 = vsel %vm1481_vm1, %v3678_v50, -inf  ;;  %v3700_v25 = vmax.f32 %v1694_v63, %v1695_v42 }
 0x21d   :  { %v1599_v61 = vrot.slane %v1598_v37, 1  ;;  %v1406_v62 = vmax.f32 %v1374_v43, 0.0  ;;  %v3702_v8 = vmax.f32 %v1687_v48, %v1688_v4  ;;  %v1606_v44 = vrot.slane %v1605_v5, 1 }
 0x21e   :  { %v1403_v41 = vmax.f32 %v1371_v13, 0.0  ;;  %v1404_v30 = vmax.f32 %v1372_v19, 0.0  ;;  %v1702_v23 = vrot.slane %v1701_v0, 2  ;;  %v1618_v9 = vrot.slane %v1617_v27, 2 }
 0x21f   :  { %v1439_v29 = vmul.f32 %v3277_v60, %v1406_v62  ;;  %v3706_v22 = vadd.f32 %v3308_v28, %v1438_v12  ;;  %v3709_v52 = vadd.f32 %v3308_v28, %v1442_v57  ;;  %v1612_v49 = vmax.f32 %v1610_v18, %v1611_v14 }
 0x220   :  { %v1436_v63 = vmul.f32 %v3277_v60, %v1403_v41  ;;  %v1437_v42 = vmul.f32 %v3277_v60, %v1404_v30  ;;  %v1651_v48 = vrot.slane %v1650_v38, 4  ;;  %v1600_v33 = vmax.f32 %v1598_v37, %v1599_v61 }
 0x221   :  { %v3715_v45 = vadd.f32 %v3308_v28, %v1439_v29  ;;  %v1607_v26 = vmax.f32 %v1605_v5, %v1606_v44  ;;  %v3724_v18 = vmax.f32 %v1701_v0, %v1702_v23  ;;  %v1619_v12 = vmax.f32 %v1617_v27, %v1618_v9 }
 0x222   :  { %v3719_v43 = vadd.f32 %v3308_v28, %v1436_v63  ;;  %v3722_v57 = vadd.f32 %v3308_v28, %v1437_v42  ;;  %v1636_v60 = vsel %vm1481_vm1, %v3706_v22, -inf  ;;  %v1613_v14 = vrot.slane %v1612_v49, 1 }
 0x223   :  { %v1643_v37 = vsel %vm1481_vm1, %v3715_v45, -inf  ;;  %v1720_v13 = vpack.c.bf16 %v3674_v58, %v3668_v55  ;;  %v1886_v61 = vpack.c.bf16 %v1600_v33, %v1600_v33  ;;  %v3738_v27 = vadd.f32 %v3308_v28, %v3658_v53 }
 0x224   :  { %v1622_v5 = vsel %vm1481_vm1, %v3719_v43, -inf  ;;  %v1629_v19 = vsel %vm1481_vm1, %v3722_v57, -inf  ;;  %v1887_v44 = vpack.c.bf16 %v1607_v26, %v1607_v26  ;;  %v1637_v41 = vrot.slane %v1636_v60, 4 }
 0x225   :  { %v1623_v0 = vrot.slane %v1622_v5, 4  ;;  %v1630_v62 = vrot.slane %v1629_v19, 4  ;;  %v1644_v30 = vrot.slane %v1643_v37, 4  ;;  %v1652_v23 = vmax.f32 %v1650_v38, %v1651_v48 }
 0x226   :  { %v1620_v9 = vrot.slane %v1619_v12, 1  ;;  %2661 = vmatmul.msk.bf16.gmra.mxu3 %vm1481_vm1, %v1720_v13  ;;  %v1657_v29 = vsel %vm1481_vm1, %v3694_v36, -inf  ;;  %v1614_v63 = vmax.f32 %v1612_v49, %v1613_v14  ;;  %v3745_v42 = vadd.f32 %v3308_v28, %v3671_v59 }
 0x227   :  { %v1624_v55 = vmax.f32 %v1622_v5, %v1623_v0  ;;  %v1631_v58 = vmax.f32 %v1629_v19, %v1630_v62  ;;  %v1638_v33 = vmax.f32 %v1636_v60, %v1637_v41  ;;  %v1653_v53 = vrot.slane %v1652_v23, 2 }
 0x228   :  { %v1658_v47 = vrot.slane %v1657_v29, 4  ;;  %v1664_v38 = vsel %vm1481_vm1, %v3709_v52, -inf  ;;  %v1951_v48 = vunpack.c.l.b16 %v1887_v44  ;;  %v1645_v13 = vmax.f32 %v1643_v37, %v1644_v30 }
 0x229   :  { %v1625_v4 = vrot.slane %v1624_v55, 2  ;;  %v1632_v26 = vrot.slane %v1631_v58, 2  ;;  %v1654_v5 = vmax.f32 %v1652_v23, %v1653_v53  ;;  %v1665_v19 = vrot.slane %v1664_v38, 4 }
 0x22a   :  { %v1639_v62 = vrot.slane %v1638_v33, 2  ;;  %v1659_v7 = vmax.f32 %v1657_v29, %v1658_v47  ;;  %v1671_v49 = vsel %vm1481_vm1, %v3738_v27, -inf  ;;  %v1950_v28 = vunpack.c.l.b16 %v1886_v61 }
 0x22b   :  { %v1626_v0 = vmax.f32 %v1624_v55, %v1625_v4  ;;  %v1621_v59 = vmax.f32 %v1619_v12, %v1620_v9  ;;  %v1655_v60 = vrot.slane %v1654_v5, 1  ;;  %v1666_v14 = vmax.f32 %v1664_v38, %v1665_v19 }
 0x22c   :  { %v1888_v41 = vpack.c.bf16 %v1614_v63, %v1614_v63  ;;  %v1633_v20 = vmax.f32 %v1631_v58, %v1632_v26  ;;  %v1660_v21 = vrot.slane %v1659_v7, 2  ;;  %v1672_v54 = vrot.slane %v1671_v49, 4 }
 0x22d   :  { %v1704_v56 = vrot.slane %v3724_v18, 1  ;;  %v1627_v44 = vrot.slane %v1626_v0, 1  ;;  %v1646_v37 = vrot.slane %v1645_v13, 2  ;;  %v1667_v30 = vrot.slane %v1666_v14, 2 }
 0x22e   :  { %v1980_v4 = vsel %vm1125_vm4, %v1951_v48, %v1950_v28  ;;  %v1640_v23 = vmax.f32 %v1638_v33, %v1639_v62  ;;  %v1661_v47 = vmax.f32 %v1659_v7, %v1660_v21  ;;  %v1673_v55 = vmax.f32 %v1671_v49, %v1672_v54 }
 0x22f   :  { %v1889_v29 = vpack.c.bf16 %v1621_v59, %v1621_v59  ;;  %v1656_v53 = vmax.f32 %v1654_v5, %v1655_v60  ;;  %v1668_v61 = vmax.f32 %v1666_v14, %v1667_v30  ;;  %v1678_v12 = vsel %vm1481_vm1, %v3745_v42, -inf }
 0x230   :  { %v1952_v9 = vunpack.c.l.b16 %v1888_v41  ;;  %v1634_v58 = vrot.slane %v1633_v20, 1  ;;  %v1662_v63 = vrot.slane %v1661_v47, 1  ;;  %v1674_v26 = vrot.slane %v1673_v55, 2 }
 0x231   :  { %v1628_v38 = vmax.f32 %v1626_v0, %v1627_v44  ;;  %v1647_v19 = vmax.f32 %v1645_v13, %v1646_v37  ;;  %v1669_v2 = vrot.slane %v1668_v61, 1  ;;  %v1679_v3 = vrot.slane %v1678_v12, 4  ;;  %v3757_v7 = vpop.f32.mrf.mxu2 }
 0x232   :  { %v1721_v48 = vpack.c.bf16 %v3722_v57, %v3719_v43  ;;  %v1641_v33 = vrot.slane %v1640_v23, 1  ;;  %v1663_v21 = vmax.f32 %v1661_v47, %v1662_v63  ;;  %v1675_v54 = vmax.f32 %v1673_v55, %v1674_v26 }
 0x233   :  { %v1953_v5 = vunpack.c.l.b16 %v1889_v29  ;;  %v1670_v62 = vmax.f32 %v1668_v61, %v1669_v2  ;;  %v1680_v49 = vmax.f32 %v1678_v12, %v1679_v3  ;;  %v1894_v28 = vpack.c.bf16 %v1656_v53, %v1656_v53 }
 0x234   :  { %v3759_v59 = vpop.f32.mrf.mxu3  ;;  %v1981_v60 = vsel %vm1127_vm5, %v1952_v9, %v1980_v4  ;;  %v1635_v0 = vmax.f32 %v1633_v20, %v1634_v58  ;;  %v1676_v13 = vrot.slane %v1675_v54, 1  ;;  %v1895_v14 = vpack.c.bf16 %v1663_v21, %v1663_v21 }
 0x235   :  { %v1890_v41 = vpack.c.bf16 %v1628_v38, %v1628_v38  ;;  %v1648_v44 = vrot.slane %v1647_v19, 1  ;;  %v1681_v37 = vrot.slane %v1680_v49, 2  ;;  %v1896_v43 = vpack.c.bf16 %v1670_v62, %v1670_v62 }
 0x236   :  { %2662 = vmatmul.msk.bf16.gmra.mxu3 %vm1481_vm1, %v1721_v48  ;;  %v1642_v57 = vmax.f32 %v1640_v23, %v1641_v33  ;;  %v1677_v30 = vmax.f32 %v1675_v54, %v1676_v13  ;;  %v1958_v47 = vunpack.c.l.b16 %v1894_v28  ;;  %v1959_v55 = vunpack.c.l.b16 %v1895_v14 }
 0x237   :  { %v4034_v2 = vrot.slane %v3702_v8, 1  ;;  %v1682_v29 = vmax.f32 %v1680_v49, %v1681_v37  ;;  %v1960_v53 = vunpack.c.l.b16 %v1896_v43  ;;  %v1891_v4 = vpack.c.bf16 %v1635_v0, %v1635_v0 }
 0x238   :  { %v1897_v20 = vpack.c.bf16 %v1677_v30, %v1677_v30  ;;  %v1982_v61 = vsel %vm1129_vm6, %v1953_v5, %v1981_v60  ;;  %v1987_v12 = vsel %vm1125_vm4, %v1959_v55, %v1958_v47  ;;  %v4035_v9 = vrot.slane %v3700_v25, 1 }
 0x239   :  { %v1691_v3 = vmax.f32 %v3702_v8, %v4034_v2  ;;  %v1954_v23 = vunpack.c.l.b16 %v1890_v41  ;;  %v1683_v63 = vrot.slane %v1682_v29, 1  ;;  %v1649_v26 = vmax.f32 %v1647_v19, %v1648_v44  ;;  %v1792_v19 = vpop.f32.mrf.mxu2 }
 0x23a   :  { %v1698_v58 = vmax.f32 %v3700_v25, %v4035_v9  ;;  %v1705_v38 = vmax.f32 %v3724_v18, %v1704_v56  ;;  %v1892_v48 = vpack.c.bf16 %v1642_v57, %v1642_v57  ;;  %v1725_v8 = vpack.c.bf16 %v3629_v31, %v3745_v42 }
 0x23b   :  { %v1684_v33 = vmax.f32 %v1682_v29, %v1683_v63  ;;  %v1983_v21 = vsel %vm1131_vm7, %v1954_v23, %v1982_v61  ;;  %v1988_v54 = vsel %vm1127_vm5, %v1960_v53, %v1987_v12  ;;  %v1726_v62 = vpack.c.bf16 %v3646_v1, %v3624_v16 }
 0x23c   :  { %v3776_v5 = vpop.f32.mrf.mxu3  ;;  %v1899_v25 = vpack.c.bf16 %v1691_v3, %v1691_v3  ;;  %v1955_v49 = vunpack.c.l.b16 %v1891_v4  ;;  %v1961_v28 = vunpack.c.l.b16 %v1897_v20  ;;  %v1900_v56 = vpack.c.bf16 %v1698_v58, %v1698_v58 }
 0x23d   :  { %v1898_v60 = vpack.c.bf16 %v1684_v33, %v1684_v33  ;;  %v1893_v18 = vpack.c.bf16 %v1649_v26, %v1649_v26  ;;  %v1901_v0 = vpack.c.bf16 %v1705_v38, %v1705_v38  ;;  %v1956_v41 = vunpack.c.l.b16 %v1892_v48 }
 0x23e   :  { %v1984_v13 = vsel %vm1133_vm8, %v1955_v49, %v1983_v21  ;;  %v1989_v14 = vsel %vm1129_vm6, %v1961_v28, %v1988_v54  ;;  %v1963_v37 = vunpack.c.l.b16 %v1899_v25  ;;  %v1964_v43 = vunpack.c.l.b16 %v1900_v56 }
 0x23f   :  { %v1962_v44 = vunpack.c.l.b16 %v1898_v60  ;;  %v1985_v57 = vsel %vm1135_vm9, %v1956_v41, %v1984_v13  ;;  %v1957_v47 = vunpack.c.l.b16 %v1893_v18  ;;  %v1965_v55 = vunpack.c.l.b16 %v1901_v0 }
 0x240   :  { %v1722_v4 = vpack.c.bf16 %v3715_v45, %v3706_v22  ;;  %v1723_v23 = vpack.c.bf16 %v3694_v36, %v3678_v50  ;;  %v1724_v45 = vpack.c.bf16 %v3738_v27, %v3709_v52 }
 0x241   :  { %v1990_v30 = vsel %vm1131_vm7, %v1962_v44, %v1989_v14  ;;  %v1986_v29 = vsel %vm4036_vm0, %v1957_v47, %v1985_v57  ;;  %v1795_v12 = vpop.f32.mrf.mxu2  ;;  %v3812_v44 = vld [vmem:[%s3978_s8] ss:$0 sm:$0xff] }
 0x242   :  { %v1991_v2 = vsel %vm1133_vm8, %v1963_v37, %v1990_v30 }
 0x243   :  { %v1992_v3 = vsel %vm1135_vm9, %v1964_v43, %v1991_v2 }
 0x244   :  { %v1993_v53 = vsel %vm4037_vm2, %v1965_v55, %v1992_v3 }
 0x245   :  { %v1995_v20 = vpack.c.b16 %v1993_v53, %v1986_v29 }
 0x246   :  { %2663 = vmatmul.msk.bf16.gmra.mxu3 %vm1481_vm1, %v1722_v4  ;;  %v4038_v4 = vld [vmem:[#allocation13_spill] sm:$0xff] }
 0x247   :  { %v3790_v61 = vpop.f32.mrf.mxu3  ;;  %2673 = vmatmul.msk.bf16.gmra.mxu2 %vm1481_vm1, %v1995_v20 }
 0x249   :  { %v1797_v58 = vpop.f32.mrf.mxu2 }
 0x24f   :  { %v3794_v9 = vpop.f32.mrf.mxu3 }
 0x251   :  { %v1800_v26 = vpop.f32.mrf.mxu2 }
 0x256   :  { %2664 = vmatmul.msk.bf16.gmra.mxu3 %vm1481_vm1, %v1723_v23  ;;  %v4039_v23 = vld [vmem:[#allocation14_spill] sm:$0xff] }
 0x257   :  { %v3799_v63 = vpop.f32.mrf.mxu3 }
 0x259   :  { %v1802_v38 = vpop.f32.mrf.mxu2 }
 0x25f   :  { %v3801_v22 = vpop.f32.mrf.mxu3 }
 0x266   :  { %2665 = vmatmul.msk.bf16.gmra.mxu3 %vm1481_vm1, %v1724_v45 }
 0x267   :  { %v3806_v48 = vpop.f32.mrf.mxu3 }
 0x270   :  { %v2017_v33 = vpop.f32.mrf.mxu2 }
 0x271   :  { %v2031_v21 = vrot.slane %v2017_v33, 1  ;;  %v2032_v54 = vrot.slane %v2017_v33, 2  ;;  %v2033_v25 = vrot.slane %v2017_v33, 3  ;;  %v2034_v50 = vrot.slane %v2017_v33, 4 }
 0x272   :  { %v2035_v36 = vrot.slane %v2017_v33, 5  ;;  %v2036_v49 = vrot.slane %v2017_v33, 6  ;;  %v2037_v28 = vrot.slane %v2017_v33, 7  ;;  %v2059_v60 = vperm.slane %v2017_v33, 0 }
 0x273   :  { %v2060_v56 = vperm.slane %v2031_v21, 0  ;;  %v2061_v18 = vperm.slane %v2032_v54, 0  ;;  %v2062_v0 = vperm.slane %v2033_v25, 0  ;;  %v2063_v13 = vperm.slane %v2034_v50, 0 }
 0x274   :  { %v2064_v14 = vperm.slane %v2035_v36, 0  ;;  %v2065_v52 = vperm.slane %v2036_v49, 0  ;;  %v2066_v27 = vperm.slane %v2037_v28, 0  ;;  %v2123_v41 = vadd.f32 %v2059_v60, %v3757_v7 }
 0x275   :  { %v2124_v37 = vadd.f32 %v2060_v56, %v1792_v19  ;;  %v2125_v43 = vadd.f32 %v2061_v18, %v1795_v12  ;;  %v2126_v57 = vadd.f32 %v2062_v0, %v1797_v58  ;;  %v2127_v30 = vadd.f32 %v2063_v13, %v1800_v26  ;;  %v4040_v12 = vld [vmem:[#allocation8_spill] sm:$0xff]  ;;  %v4041_v26 = vld [vmem:[#allocation10_spill] sm:$0xff] }
 0x276   :  { %v2128_v47 = vadd.f32 %v2064_v14, %v1802_v38  ;;  %v2129_v55 = vadd.f32 %v2065_v52, %v3759_v59  ;;  %v2130_v2 = vadd.f32 %v2066_v27, %v3776_v5  ;;  %v2155_v3 = vmul.f32 %v3271_v51, %v2123_v41  ;;  %2666 = vmatmul.msk.bf16.gmra.mxu3 %vm1481_vm1, %v1725_v8  ;;  %v3829_v51 = vpop.f32.mrf.mxu3 }
 0x277   :  { %v2156_v29 = vmul.f32 %v3280_v6, %v2124_v37  ;;  %v2157_v7 = vmul.f32 %v3284_v39, %v2125_v43  ;;  %v2158_v53 = vmul.f32 %v3297_v11, %v2126_v57  ;;  %v2159_v20 = vmul.f32 %v4038_v4, %v2127_v30 }
 0x278   :  { %v2160_v19 = vmul.f32 %v4039_v23, %v2128_v47  ;;  %v2161_v58 = vmul.f32 %v4040_v12, %v2129_v55  ;;  %v2162_v45 = vmul.f32 %v4041_v26, %v2130_v2  ;;  %v2190_v59 = vadd.f32 %v3812_v44, %v2155_v3 }
 0x279   :  { %v2191_v6 = vadd.f32 %v3812_v44, %v2156_v29  ;;  %v2192_v39 = vadd.f32 %v3812_v44, %v2157_v7  ;;  %v2193_v11 = vadd.f32 %v3812_v44, %v2158_v53  ;;  %v2194_v5 = vadd.f32 %v3812_v44, %v2159_v20 }
 0x27a   :  { %v2195_v38 = vadd.f32 %v3812_v44, %v2160_v19  ;;  %v2196_v33 = vadd.f32 %v3812_v44, %v2161_v58  ;;  %v2197_v21 = vadd.f32 %v3812_v44, %v2162_v45  ;;  %v2222_v54 = vmax.f32 %v2190_v59, 0.0 }
 0x27b   :  { %v2223_v31 = vmax.f32 %v2191_v6, 0.0  ;;  %v2224_v42 = vmax.f32 %v2192_v39, 0.0  ;;  %v2225_v8 = vmax.f32 %v2193_v11, 0.0  ;;  %v2226_v25 = vmax.f32 %v2194_v5, 0.0  ;;  %v2019_v6 = vpop.f32.mrf.mxu2 }
 0x27c   :  { %v2227_v50 = vmax.f32 %v2195_v38, 0.0  ;;  %v2228_v36 = vmax.f32 %v2196_v33, 0.0  ;;  %v2229_v49 = vmax.f32 %v2197_v21, 0.0  ;;  %v2254_v28 = vrot.slane %v2222_v54, 4 }
 0x27d   :  { %v2260_v60 = vrot.slane %v2223_v31, 4  ;;  %v2266_v56 = vrot.slane %v2224_v42, 4  ;;  %v2272_v18 = vrot.slane %v2225_v8, 4  ;;  %v2278_v0 = vrot.slane %v2226_v25, 4 }
 0x27e   :  { %v2255_v13 = vmax.f32 %v2222_v54, %v2254_v28  ;;  %v2284_v14 = vrot.slane %v2227_v50, 4  ;;  %v2290_v52 = vrot.slane %v2228_v36, 4  ;;  %v2296_v27 = vrot.slane %v2229_v49, 4  ;;  %v1825_v12 = vpop.f32.mrf.mxu3 }
 0x27f   :  { %v2261_v41 = vmax.f32 %v2223_v31, %v2260_v60  ;;  %v2267_v37 = vmax.f32 %v2224_v42, %v2266_v56  ;;  %v2273_v43 = vmax.f32 %v2225_v8, %v2272_v18  ;;  %v2279_v57 = vmax.f32 %v2226_v25, %v2278_v0 }
 0x280   :  { %v2256_v30 = vrot.slane %v2255_v13, 2  ;;  %v2285_v47 = vmax.f32 %v2227_v50, %v2284_v14  ;;  %v2291_v55 = vmax.f32 %v2228_v36, %v2290_v52  ;;  %v2297_v2 = vmax.f32 %v2229_v49, %v2296_v27 }
 0x281   :  { %v2262_v3 = vrot.slane %v2261_v41, 2  ;;  %v2268_v29 = vrot.slane %v2267_v37, 2  ;;  %v2274_v7 = vrot.slane %v2273_v43, 2  ;;  %v2280_v53 = vrot.slane %v2279_v57, 2 }
 0x282   :  { %v2257_v4 = vmax.f32 %v2255_v13, %v2256_v30  ;;  %v2286_v20 = vrot.slane %v2285_v47, 2  ;;  %v2292_v23 = vrot.slane %v2291_v55, 2  ;;  %v2298_v19 = vrot.slane %v2297_v2, 2 }
 0x283   :  { %v2263_v58 = vmax.f32 %v2261_v41, %v2262_v3  ;;  %v2269_v26 = vmax.f32 %v2267_v37, %v2268_v29  ;;  %v3838_v45 = vmax.f32 %v2273_v43, %v2274_v7  ;;  %v3840_v59 = vmax.f32 %v2279_v57, %v2280_v53  ;;  %v4043_v29 = vld [vmem:[#allocation9_spill] sm:$0xff] }
 0x284   :  { %v2258_v39 = vrot.slane %v2257_v4, 1  ;;  %v3842_v11 = vmax.f32 %v2285_v47, %v2286_v20  ;;  %v3844_v5 = vmax.f32 %v2291_v55, %v2292_v23  ;;  %v3846_v21 = vmax.f32 %v2297_v2, %v2298_v19  ;;  %v4042_v2 = vld [vmem:[#allocation7_spill] sm:$0xff]  ;;  %v4045_v20 = vld [vmem:[#allocation18_spill] sm:$0xff]  ;;  %v4046_v23 = vld [vmem:[#allocation16_spill] sm:$0xff] }
 0x285   :  { %v2264_v38 = vrot.slane %v2263_v58, 1  ;;  %v2270_v33 = vrot.slane %v2269_v26, 1  ;;  %v2038_v54 = vrot.slane %v2019_v6, 1  ;;  %v2276_v42 = vrot.slane %v3838_v45, 1 }
 0x286   :  { %v3848_v31 = vmax.f32 %v2257_v4, %v2258_v39  ;;  %v2282_v8 = vrot.slane %v3840_v59, 1  ;;  %v2288_v25 = vrot.slane %v3842_v11, 1  ;;  %v2294_v50 = vrot.slane %v3844_v5, 1  ;;  %2667 = vmatmul.msk.bf16.gmra.mxu3 %vm1481_vm1, %v1726_v62  ;;  %v1827_v47 = vpop.f32.mrf.mxu3  ;;  %v4044_v4 = vld [vmem:[#allocation11_spill] sm:$0xff]  ;;  %vm4050_vm1 = vmmov %vm4036_vm0 }
 0x287   :  { %v2039_v36 = vrot.slane %v2019_v6, 2  ;;  %v2040_v49 = vrot.slane %v2019_v6, 3  ;;  %v2041_v28 = vrot.slane %v2019_v6, 4  ;;  %v3858_v60 = vmax.f32 %v2263_v58, %v2264_v38  ;;  %v4047_v58 = vld [vmem:[#allocation12_spill] sm:$0xff] }
 0x288   :  { %v2042_v56 = vrot.slane %v2019_v6, 5  ;;  %v2067_v18 = vperm.slane %v2019_v6, 0  ;;  %v2068_v0 = vperm.slane %v2038_v54, 0  ;;  %v2043_v27 = vrot.slane %v2019_v6, 6 }
 0x289   :  { %v2069_v13 = vperm.slane %v2039_v36, 0  ;;  %v2070_v14 = vperm.slane %v2040_v49, 0  ;;  %v2071_v52 = vperm.slane %v2041_v28, 0  ;;  %v2044_v57 = vrot.slane %v2019_v6, 7  ;;  %v4048_v36 = vld [vmem:[#allocation15_spill] sm:$0xff] }
 0x28a   :  { %v2072_v41 = vperm.slane %v2042_v56, 0  ;;  %v2131_v37 = vadd.f32 %v2067_v18, %v3790_v61  ;;  %v2132_v43 = vadd.f32 %v2068_v0, %v3794_v9  ;;  %v2073_v62 = vperm.slane %v2043_v27, 0 }
 0x28b   :  { %v2133_v30 = vadd.f32 %v2069_v13, %v3799_v63  ;;  %v2134_v16 = vadd.f32 %v2070_v14, %v3801_v22  ;;  %v2135_v1 = vadd.f32 %v2071_v52, %v3806_v48  ;;  %v2074_v53 = vperm.slane %v2044_v57, 0 }
 0x28c   :  { %v2136_v55 = vadd.f32 %v2072_v41, %v3829_v51  ;;  %v2163_v3 = vmul.f32 %v4042_v2, %v2131_v37  ;;  %v2164_v7 = vmul.f32 %v4043_v29, %v2132_v43  ;;  %v2137_v63 = vadd.f32 %v2073_v62, %v1825_v12  ;;  %v4049_v12 = vld [vmem:[#allocation17_spill] sm:$0xff] }
 0x28d   :  { %v2165_v61 = vmul.f32 %v4044_v4, %v2133_v30  ;;  %v2166_v9 = vmul.f32 %v4045_v20, %v2134_v16  ;;  %v2167_v19 = vmul.f32 %v4046_v23, %v2135_v1  ;;  %v2138_v39 = vadd.f32 %v2074_v53, %v1827_v47 }
 0x28e   :  { %v2168_v22 = vmul.f32 %v4047_v58, %v2136_v55  ;;  %v2198_v48 = vadd.f32 %v3812_v44, %v2163_v3  ;;  %v2199_v6 = vadd.f32 %v3812_v44, %v2164_v7  ;;  %v2169_v49 = vmul.f32 %v4048_v36, %v2137_v63 }
 0x28f   :  { %v2200_v51 = vadd.f32 %v3812_v44, %v2165_v61  ;;  %v2201_v38 = vadd.f32 %v3812_v44, %v2166_v9  ;;  %v2202_v54 = vadd.f32 %v3812_v44, %v2167_v19  ;;  %v2170_v0 = vmul.f32 %v4049_v12, %v2138_v39 }
 0x290   :  { %v2203_v28 = vadd.f32 %v3812_v44, %v2168_v22  ;;  %v2230_v56 = vmax.f32 %v2198_v48, 0.0  ;;  %v2231_v18 = vmax.f32 %v2199_v6, 0.0  ;;  %v2204_v27 = vadd.f32 %v3812_v44, %v2169_v49 }
 0x291   :  { %v2232_v13 = vmax.f32 %v2200_v51, 0.0  ;;  %v2233_v14 = vmax.f32 %v2201_v38, 0.0  ;;  %v2234_v52 = vmax.f32 %v2202_v54, 0.0  ;;  %v2271_v41 = vmax.f32 %v2269_v26, %v2270_v33 }
 0x292   :  { %v2235_v37 = vmax.f32 %v2203_v28, 0.0  ;;  %v2302_v43 = vrot.slane %v2230_v56, 4  ;;  %v2308_v57 = vrot.slane %v2231_v18, 4  ;;  %v2236_v62 = vmax.f32 %v2204_v27, 0.0 }
 0x293   :  { %v2314_v30 = vrot.slane %v2232_v13, 4  ;;  %v2320_v16 = vrot.slane %v2233_v14, 4  ;;  %v2326_v1 = vrot.slane %v2234_v52, 4  ;;  %v2205_v3 = vadd.f32 %v3812_v44, %v2170_v0 }
 0x294   :  { %v2303_v47 = vmax.f32 %v2230_v56, %v2302_v43  ;;  %v2309_v55 = vmax.f32 %v2231_v18, %v2308_v57  ;;  %v2332_v2 = vrot.slane %v2235_v37, 4  ;;  %v2338_v4 = vrot.slane %v2236_v62, 4 }
 0x295   :  { %v2315_v29 = vmax.f32 %v2232_v13, %v2314_v30  ;;  %v2321_v7 = vmax.f32 %v2233_v14, %v2320_v16  ;;  %v2327_v53 = vmax.f32 %v2234_v52, %v2326_v1  ;;  %v2277_v26 = vmax.f32 %v3838_v45, %v2276_v42 }
 0x296   :  { %v2304_v33 = vrot.slane %v2303_v47, 2  ;;  %v2310_v61 = vrot.slane %v2309_v55, 2  ;;  %v2333_v20 = vmax.f32 %v2235_v37, %v2332_v2  ;;  %v2339_v63 = vmax.f32 %v2236_v62, %v2338_v4 }
 0x297   :  { %v2316_v9 = vrot.slane %v2315_v29, 2  ;;  %v2322_v23 = vrot.slane %v2321_v7, 2  ;;  %v2328_v19 = vrot.slane %v2327_v53, 2  ;;  %v2237_v6 = vmax.f32 %v2205_v3, 0.0 }
 0x298   :  { %v2305_v58 = vmax.f32 %v2303_v47, %v2304_v33  ;;  %v2311_v22 = vmax.f32 %v2309_v55, %v2310_v61  ;;  %v2334_v48 = vrot.slane %v2333_v20, 2  ;;  %v2340_v54 = vrot.slane %v2339_v63, 2 }
 0x299   :  { %v2317_v39 = vmax.f32 %v2315_v29, %v2316_v9  ;;  %v2323_v51 = vmax.f32 %v2321_v7, %v2322_v23  ;;  %v2329_v38 = vmax.f32 %v2327_v53, %v2328_v19  ;;  %v2478_v36 = vsel %vm1125_vm4, %v3858_v60, %v3848_v31  ;;  %v1830_v28 = vpop.f32.mrf.mxu3 }
 0x29a   :  { %v2306_v45 = vrot.slane %v2305_v58, 1  ;;  %v2312_v42 = vrot.slane %v2311_v22, 1  ;;  %v2335_v49 = vmax.f32 %v2333_v20, %v2334_v48  ;;  %v2341_v0 = vmax.f32 %v2339_v63, %v2340_v54 }
 0x29b   :  { %v2318_v56 = vrot.slane %v2317_v39, 1  ;;  %v2324_v18 = vrot.slane %v2323_v51, 1  ;;  %v2330_v12 = vrot.slane %v2329_v38, 1  ;;  %v2283_v13 = vmax.f32 %v3840_v59, %v2282_v8 }
 0x29c   :  { %v2307_v14 = vmax.f32 %v2305_v58, %v2306_v45  ;;  %v2313_v52 = vmax.f32 %v2311_v22, %v2312_v42  ;;  %v2344_v27 = vrot.slane %v2237_v6, 4  ;;  %v2289_v37 = vmax.f32 %v3842_v11, %v2288_v25 }
 0x29d   :  { %v2319_v31 = vmax.f32 %v2317_v39, %v2318_v56  ;;  %v2336_v60 = vrot.slane %v2335_v49, 1  ;;  %v2300_v43 = vrot.slane %v3846_v21, 1  ;;  %v2325_v57 = vmax.f32 %v2323_v51, %v2324_v18 }
 0x29e   :  { %v2485_v30 = vsel %vm1125_vm4, %v2313_v52, %v2307_v14  ;;  %v2345_v16 = vmax.f32 %v2237_v6, %v2344_v27  ;;  %v2479_v1 = vsel %vm1127_vm5, %v2271_v41, %v2478_v36  ;;  %v2331_v62 = vmax.f32 %v2329_v38, %v2330_v12 }
 0x29f   :  { %v2342_v47 = vrot.slane %v2341_v0, 1  ;;  %v2486_v59 = vsel %vm1127_vm5, %v2319_v31, %v2485_v30  ;;  %v2480_v8 = vsel %vm1129_vm6, %v2277_v26, %v2479_v1  ;;  %v2295_v11 = vmax.f32 %v3844_v5, %v2294_v50 }
 0x2a0   :  { %v2487_v55 = vsel %vm1129_vm6, %v2325_v57, %v2486_v59  ;;  %v2346_v25 = vrot.slane %v2345_v16, 2  ;;  %v2481_v2 = vsel %vm1131_vm7, %v2283_v13, %v2480_v8  ;;  %v2301_v29 = vmax.f32 %v3846_v21, %v2300_v43 }
 0x2a1   :  { %v2488_v3 = vsel %vm1131_vm7, %v2331_v62, %v2487_v55  ;;  %v2482_v41 = vsel %vm1133_vm8, %v2289_v37, %v2481_v2  ;;  %v2337_v7 = vmax.f32 %v2335_v49, %v2336_v60  ;;  %v1832_v26 = vpop.f32.mrf.mxu3  ;;  %v2343_v33 = vmax.f32 %v2341_v0, %v2342_v47 }
 0x2a2   :  { %v2347_v53 = vmax.f32 %v2345_v16, %v2346_v25  ;;  %v2483_v4 = vsel %vm1135_vm9, %v2295_v11, %v2482_v41 }
 0x2a3   :  { %v2484_v61 = vsel %vm4050_vm1, %v2301_v29, %v2483_v4  ;;  %v2489_v20 = vsel %vm1133_vm8, %v2337_v7, %v2488_v3 }
 0x2a4   :  { %v2348_v5 = vrot.slane %v2347_v53, 1  ;;  %2510 = vst [vmem:[%s3979_s9] sm:$0xff] %v2484_v61  ;;  %v2490_v21 = vsel %vm1135_vm9, %v2343_v33, %v2489_v20 }
 0x2a6   :  { %v2349_v50 = vmax.f32 %v2347_v53, %v2348_v5 }
 0x2a8   :  { %v2491_v9 = vsel %vm4051_vm3, %v2349_v50, %v2490_v21 }
 0x2a9   :  { %2511 = vst [vmem:[%s3979_s9 + $0x8] sm:$0xff] %v2491_v9  ;;  %v1835_v23 = vpop.f32.mrf.mxu3 }
 0x2b1   :  { %v1837_v19 = vpop.f32.mrf.mxu3 }
 0x2b9   :  { %v1840_v63 = vpop.f32.mrf.mxu3 }
 0x2c1   :  { %v1842_v58 = vpop.f32.mrf.mxu3 }
 0x2c9   :  { %v1845_v22 = vpop.f32.mrf.mxu3 }
 0x2ca   :  { %v2022_v48 = vpop.f32.mrf.mxu2 }
 0x2cb   :  { %v2045_v6 = vrot.slane %v2022_v48, 1  ;;  %v2046_v39 = vrot.slane %v2022_v48, 2  ;;  %v2047_v51 = vrot.slane %v2022_v48, 3  ;;  %v2048_v38 = vrot.slane %v2022_v48, 4 }
 0x2cc   :  { %v2075_v54 = vperm.slane %v2022_v48, 0  ;;  %v2049_v36 = vrot.slane %v2022_v48, 5  ;;  %v2050_v45 = vrot.slane %v2022_v48, 6  ;;  %v2051_v42 = vrot.slane %v2022_v48, 7 }
 0x2cd   :  { %v2076_v49 = vperm.slane %v2045_v6, 0  ;;  %v2077_v56 = vperm.slane %v2046_v39, 0  ;;  %v2078_v18 = vperm.slane %v2047_v51, 0  ;;  %v2079_v12 = vperm.slane %v2048_v38, 0 }
 0x2ce   :  { %v2139_v0 = vadd.f32 %v2075_v54, %v1830_v28  ;;  %v2080_v13 = vperm.slane %v2049_v36, 0  ;;  %v2081_v14 = vperm.slane %v2050_v45, 0  ;;  %v2082_v30 = vperm.slane %v2051_v42, 0 }
 0x2cf   :  { %v2140_v52 = vadd.f32 %v2076_v49, %v1832_v26  ;;  %v2141_v27 = vadd.f32 %v2077_v56, %v1835_v23  ;;  %v2142_v37 = vadd.f32 %v2078_v18, %v1837_v19  ;;  %v2143_v31 = vadd.f32 %v2079_v12, %v1840_v63 }
 0x2d0   :  { %v2171_v60 = vmul.f32 %v3530_v17, %v2139_v0  ;;  %v2144_v43 = vadd.f32 %v2080_v13, %v1842_v58  ;;  %v2145_v57 = vadd.f32 %v2081_v14, %v1845_v22 }
 0x2d1   :  { %v2172_v16 = vmul.f32 %v3539_v35, %v2140_v52  ;;  %v2173_v1 = vmul.f32 %v3536_v34, %v2141_v27  ;;  %v2174_v62 = vmul.f32 %v3533_v15, %v2142_v37  ;;  %v2175_v47 = vmul.f32 %v3603_v32, %v2143_v31  ;;  %v1847_v28 = vpop.f32.mrf.mxu3 }
 0x2d2   :  { %v2206_v59 = vadd.f32 %v3812_v44, %v2171_v60  ;;  %v2176_v8 = vmul.f32 %v3542_v40, %v2144_v43  ;;  %v2177_v55 = vmul.f32 %v3545_v46, %v2145_v57  ;;  %v2146_v11 = vadd.f32 %v2082_v30, %v1847_v28 }
 0x2d3   :  { %v2207_v17 = vadd.f32 %v3812_v44, %v2172_v16  ;;  %v2208_v25 = vadd.f32 %v3812_v44, %v2173_v1  ;;  %v2209_v35 = vadd.f32 %v3812_v44, %v2174_v62  ;;  %v2210_v34 = vadd.f32 %v3812_v44, %v2175_v47 }
 0x2d4   :  { %v2238_v2 = vmax.f32 %v2206_v59, 0.0  ;;  %v2211_v15 = vadd.f32 %v3812_v44, %v2176_v8  ;;  %v2212_v32 = vadd.f32 %v3812_v44, %v2177_v55  ;;  %v2178_v3 = vmul.f32 %v3548_v24, %v2146_v11 }
 0x2d5   :  { %v2239_v29 = vmax.f32 %v2207_v17, 0.0  ;;  %v2240_v40 = vmax.f32 %v2208_v25, 0.0  ;;  %v2241_v41 = vmax.f32 %v2209_v35, 0.0  ;;  %v2242_v46 = vmax.f32 %v2210_v34, 0.0 }
 0x2d6   :  { %v2350_v7 = vrot.slane %v2238_v2, 4  ;;  %v2243_v53 = vmax.f32 %v2211_v15, 0.0  ;;  %v2244_v4 = vmax.f32 %v2212_v32, 0.0  ;;  %v2213_v26 = vadd.f32 %v3812_v44, %v2178_v3 }
 0x2d7   :  { %v2356_v33 = vrot.slane %v2239_v29, 4  ;;  %v2362_v61 = vrot.slane %v2240_v40, 4  ;;  %v2368_v20 = vrot.slane %v2241_v41, 4  ;;  %v2374_v5 = vrot.slane %v2242_v46, 4 }
 0x2d8   :  { %v2351_v50 = vmax.f32 %v2238_v2, %v2350_v7  ;;  %v2380_v21 = vrot.slane %v2243_v53, 4  ;;  %v2386_v9 = vrot.slane %v2244_v4, 4  ;;  %v2245_v23 = vmax.f32 %v2213_v26, 0.0  ;;  %v2024_v7 = vpop.f32.mrf.mxu2 }
 0x2d9   :  { %v2357_v19 = vmax.f32 %v2239_v29, %v2356_v33  ;;  %v2363_v63 = vmax.f32 %v2240_v40, %v2362_v61  ;;  %v2369_v24 = vmax.f32 %v2241_v41, %v2368_v20  ;;  %v2375_v58 = vmax.f32 %v2242_v46, %v2374_v5  ;;  %v1850_v22 = vpop.f32.mrf.mxu3 }
 0x2da   :  { %v2352_v48 = vrot.slane %v2351_v50, 2  ;;  %v2381_v6 = vmax.f32 %v2243_v53, %v2380_v21  ;;  %v2387_v39 = vmax.f32 %v2244_v4, %v2386_v9  ;;  %v2392_v51 = vrot.slane %v2245_v23, 4 }
 0x2db   :  { %v2358_v38 = vrot.slane %v2357_v19, 2  ;;  %v2364_v54 = vrot.slane %v2363_v63, 2  ;;  %v2370_v36 = vrot.slane %v2369_v24, 2  ;;  %v2376_v45 = vrot.slane %v2375_v58, 2 }
 0x2dc   :  { %v2353_v42 = vmax.f32 %v2351_v50, %v2352_v48  ;;  %v2382_v49 = vrot.slane %v2381_v6, 2  ;;  %v2388_v56 = vrot.slane %v2387_v39, 2  ;;  %v2393_v18 = vmax.f32 %v2245_v23, %v2392_v51  ;;  %v4053_v51 = vld [vmem:[#allocation5_spill] sm:$0xff] }
 0x2dd   :  { %v2359_v12 = vmax.f32 %v2357_v19, %v2358_v38  ;;  %v2365_v0 = vmax.f32 %v2363_v63, %v2364_v54  ;;  %v2371_v13 = vmax.f32 %v2369_v24, %v2370_v36  ;;  %v2377_v14 = vmax.f32 %v2375_v58, %v2376_v45  ;;  %v4054_v54 = vld [vmem:[#allocation19_spill] sm:$0xff]  ;;  %v4055_v45 = vld [vmem:[#allocation20_spill] sm:$0xff] }
 0x2de   :  { %v2354_v52 = vrot.slane %v2353_v42, 1  ;;  %v2383_v27 = vmax.f32 %v2381_v6, %v2382_v49  ;;  %v2389_v37 = vmax.f32 %v2387_v39, %v2388_v56  ;;  %v2394_v31 = vrot.slane %v2393_v18, 2  ;;  %v4056_v49 = vld [vmem:[#allocation2_spill] sm:$0xff] }
 0x2df   :  { %v2360_v60 = vrot.slane %v2359_v12, 1  ;;  %v2366_v43 = vrot.slane %v2365_v0, 1  ;;  %v2372_v57 = vrot.slane %v2371_v13, 1  ;;  %v2378_v30 = vrot.slane %v2377_v14, 1 }
 0x2e0   :  { %v2384_v16 = vrot.slane %v2383_v27, 1  ;;  %v2390_v1 = vrot.slane %v2389_v37, 1  ;;  %v2395_v62 = vmax.f32 %v2393_v18, %v2394_v31  ;;  %v2355_v47 = vmax.f32 %v2353_v42, %v2354_v52 }
 0x2e1   :  { %v2361_v28 = vmax.f32 %v2359_v12, %v2360_v60  ;;  %v2367_v59 = vmax.f32 %v2365_v0, %v2366_v43  ;;  %v1852_v8 = vpop.f32.mrf.mxu3  ;;  %v2373_v11 = vmax.f32 %v2371_v13, %v2372_v57  ;;  %v2379_v35 = vmax.f32 %v2377_v14, %v2378_v30 }
 0x2e2   :  { %v2396_v55 = vrot.slane %v2395_v62, 1  ;;  %v2385_v17 = vmax.f32 %v2383_v27, %v2384_v16  ;;  %v2391_v2 = vmax.f32 %v2389_v37, %v2390_v1  ;;  %v2052_v4 = vrot.slane %v2024_v7, 1  ;;  %v4057_v37 = vld [vmem:[#allocation22_spill] sm:$0xff] }
 0x2e3   :  { %v2492_v25 = vsel %vm1125_vm4, %v2361_v28, %v2355_v47  ;;  %v2053_v26 = vrot.slane %v2024_v7, 2  ;;  %v2054_v33 = vrot.slane %v2024_v7, 3  ;;  %v2055_v61 = vrot.slane %v2024_v7, 4 }
 0x2e4   :  { %v2493_v34 = vsel %vm1127_vm5, %v2367_v59, %v2492_v25  ;;  %v2397_v32 = vmax.f32 %v2395_v62, %v2396_v55  ;;  %v2084_v20 = vperm.slane %v2052_v4, 0  ;;  %v2083_v50 = vperm.slane %v2024_v7, 0 }
 0x2e5   :  { %v2494_v15 = vsel %vm1129_vm6, %v2373_v11, %v2493_v34  ;;  %v2085_v5 = vperm.slane %v2053_v26, 0  ;;  %v2086_v9 = vperm.slane %v2054_v33, 0  ;;  %v2087_v63 = vperm.slane %v2055_v61, 0 }
 0x2e6   :  { %v2495_v3 = vsel %vm1131_vm7, %v2379_v35, %v2494_v15  ;;  %v2148_v21 = vadd.f32 %v2084_v20, %v1852_v8  ;;  %v2147_v24 = vadd.f32 %v2083_v50, %v1850_v22  ;;  %v2056_v39 = vrot.slane %v2024_v7, 5 }
 0x2e7   :  { %v2496_v29 = vsel %vm1133_vm8, %v2385_v17, %v2495_v3  ;;  %v2057_v60 = vrot.slane %v2024_v7, 6 }
 0x2e8   :  { %v2497_v40 = vsel %vm1135_vm9, %v2391_v2, %v2496_v29  ;;  %v2180_v6 = vmul.f32 %v3554_v10, %v2148_v21  ;;  %v2179_v36 = vmul.f32 %v4054_v54, %v2147_v24  ;;  %v2088_v12 = vperm.slane %v2056_v39, 0  ;;  %v4058_v2 = vld [vmem:[#allocation21_spill] sm:$0xff]  ;;  %v4059_v24 = vld [vmem:[#allocation3_spill] sm:$0xff] }
 0x2e9   :  { %v2498_v41 = vsel %vm4052_vm11, %v2397_v32, %v2497_v40  ;;  %v1855_v46 = vpop.f32.mrf.mxu3  ;;  %v2089_v28 = vperm.slane %v2057_v60, 0  ;;  %v2058_v32 = vrot.slane %v2024_v7, 7 }
 0x2ea   :  { %2512 = vst [vmem:[%s3979_s9 + $0x10] sm:$0xff] %v2498_v41  ;;  %v2149_v23 = vadd.f32 %v2085_v5, %v1855_v46  ;;  %v2215_v18 = vadd.f32 %v3812_v44, %v2180_v6  ;;  %v2214_v22 = vadd.f32 %v3812_v44, %v2179_v36 }
 0x2eb   :  { %v2090_v33 = vperm.slane %v2058_v32, 0 }
 0x2ec   :  { %v2181_v38 = vmul.f32 %v4053_v51, %v2149_v23  ;;  %v2247_v27 = vmax.f32 %v2215_v18, 0.0  ;;  %v2246_v57 = vmax.f32 %v2214_v22, 0.0 }
 0x2ee   :  { %v2216_v0 = vadd.f32 %v3812_v44, %v2181_v38  ;;  %v2404_v62 = vrot.slane %v2247_v27, 4  ;;  %v2398_v55 = vrot.slane %v2246_v57, 4 }
 0x2f0   :  { %v2248_v43 = vmax.f32 %v2216_v0, 0.0  ;;  %v2405_v35 = vmax.f32 %v2247_v27, %v2404_v62  ;;  %v2399_v29 = vmax.f32 %v2246_v57, %v2398_v55 }
 0x2f1   :  { %v1857_v53 = vpop.f32.mrf.mxu3 }
 0x2f2   :  { %v2150_v58 = vadd.f32 %v2086_v9, %v1857_v53  ;;  %v2410_v59 = vrot.slane %v2248_v43, 4  ;;  %v2406_v53 = vrot.slane %v2405_v35, 2  ;;  %v2400_v5 = vrot.slane %v2399_v29, 2 }
 0x2f4   :  { %v2182_v42 = vmul.f32 %v4055_v45, %v2150_v58  ;;  %v2411_v3 = vmax.f32 %v2248_v43, %v2410_v59  ;;  %v2401_v6 = vmax.f32 %v2399_v29, %v2400_v5 }
 0x2f6   :  { %v2217_v14 = vadd.f32 %v3812_v44, %v2182_v42  ;;  %v2412_v61 = vrot.slane %v2411_v3, 2  ;;  %v2402_v18 = vrot.slane %v2401_v6, 1 }
 0x2f8   :  { %v2249_v30 = vmax.f32 %v2217_v14, 0.0 }
 0x2f9   :  { %v1860_v19 = vpop.f32.mrf.mxu3 }
 0x2fa   :  { %v2151_v48 = vadd.f32 %v2087_v63, %v1860_v19  ;;  %v2416_v11 = vrot.slane %v2249_v30, 4  ;;  %v2407_v19 = vmax.f32 %v2405_v35, %v2406_v53 }
 0x2fc   :  { %v2183_v56 = vmul.f32 %v4056_v49, %v2151_v48  ;;  %v2417_v40 = vmax.f32 %v2249_v30, %v2416_v11  ;;  %v2413_v48 = vmax.f32 %v2411_v3, %v2412_v61  ;;  %v2408_v36 = vrot.slane %v2407_v19, 1 }
 0x2fe   :  { %v2218_v52 = vadd.f32 %v3812_v44, %v2183_v56  ;;  %v2418_v50 = vrot.slane %v2417_v40, 2  ;;  %v2414_v49 = vrot.slane %v2413_v48, 1  ;;  %v2409_v22 = vmax.f32 %v2407_v19, %v2408_v36 }
 0x300   :  { %v2250_v1 = vmax.f32 %v2218_v52, 0.0  ;;  %v2419_v39 = vmax.f32 %v2417_v40, %v2418_v50  ;;  %v2415_v52 = vmax.f32 %v2413_v48, %v2414_v49 }
 0x301   :  { %v1862_v13 = vpop.f32.mrf.mxu3 }
 0x302   :  { %v2152_v10 = vadd.f32 %v2088_v12, %v1862_v13  ;;  %v2422_v25 = vrot.slane %v2250_v1, 4  ;;  %v2420_v12 = vrot.slane %v2419_v39, 1 }
 0x304   :  { %v2184_v31 = vmul.f32 %v4057_v37, %v2152_v10  ;;  %v2423_v46 = vmax.f32 %v2250_v1, %v2422_v25  ;;  %v2403_v37 = vmax.f32 %v2401_v6, %v2402_v18 }
 0x306   :  { %v2219_v16 = vadd.f32 %v3812_v44, %v2184_v31  ;;  %v2424_v23 = vrot.slane %v2423_v46, 2  ;;  %v2421_v31 = vmax.f32 %v2419_v39, %v2420_v12 }
 0x308   :  { %v2251_v47 = vmax.f32 %v2219_v16, 0.0  ;;  %v2425_v54 = vmax.f32 %v2423_v46, %v2424_v23 }
 0x309   :  { %v1865_v8 = vpop.f32.mrf.mxu3 }
 0x30a   :  { %v2153_v17 = vadd.f32 %v2089_v28, %v1865_v8  ;;  %v2428_v34 = vrot.slane %v2251_v47, 4  ;;  %v2426_v13 = vrot.slane %v2425_v54, 1 }
 0x30c   :  { %v2185_v15 = vmul.f32 %v4058_v2, %v2153_v17  ;;  %v2429_v4 = vmax.f32 %v2251_v47, %v2428_v34  ;;  %v2427_v43 = vmax.f32 %v2425_v54, %v2426_v13 }
 0x30e   :  { %v2220_v41 = vadd.f32 %v3812_v44, %v2185_v15  ;;  %v2430_v63 = vrot.slane %v2429_v4, 2 }
 0x310   :  { %v2252_v26 = vmax.f32 %v2220_v41, 0.0  ;;  %v2431_v45 = vmax.f32 %v2429_v4, %v2430_v63 }
 0x311   :  { %v1867_v20 = vpop.f32.mrf.mxu3 }
 0x312   :  { %v2434_v21 = vrot.slane %v2252_v26, 4  ;;  %v2154_v9 = vadd.f32 %v2090_v33, %v1867_v20  ;;  %v2432_v14 = vrot.slane %v2431_v45, 1 }
 0x314   :  { %v2435_v7 = vmax.f32 %v2252_v26, %v2434_v21  ;;  %v2186_v58 = vmul.f32 %v4059_v24, %v2154_v9  ;;  %v2433_v57 = vmax.f32 %v2431_v45, %v2432_v14 }
 0x316   :  { %v2436_v51 = vrot.slane %v2435_v7, 2  ;;  %v2221_v38 = vadd.f32 %v3812_v44, %v2186_v58  ;;  %v2499_v44 = vsel %vm1125_vm4, %v2409_v22, %v2403_v37 }
 0x317   :  { %v2500_v16 = vsel %vm1127_vm5, %v2415_v52, %v2499_v44 }
 0x318   :  { %v2253_v42 = vmax.f32 %v2221_v38, 0.0  ;;  %v2437_v56 = vmax.f32 %v2435_v7, %v2436_v51  ;;  %v2501_v62 = vsel %vm1129_vm6, %v2421_v31, %v2500_v16 }
 0x319   :  { %v2502_v28 = vsel %vm1131_vm7, %v2427_v43, %v2501_v62 }
 0x31a   :  { %v2440_v0 = vrot.slane %v2253_v42, 4  ;;  %v2438_v27 = vrot.slane %v2437_v56, 1  ;;  %v2503_v59 = vsel %vm1133_vm8, %v2433_v57, %v2502_v28 }
 0x31c   :  { %v2441_v10 = vmax.f32 %v2253_v42, %v2440_v0  ;;  %v2439_v1 = vmax.f32 %v2437_v56, %v2438_v27 }
 0x31e   :  { %v2442_v60 = vrot.slane %v2441_v10, 2  ;;  %v2504_v55 = vsel %vm1135_vm9, %v2439_v1, %v2503_v59 }
 0x320   :  { %v2443_v30 = vmax.f32 %v2441_v10, %v2442_v60 }
 0x322   :  { %v2444_v47 = vrot.slane %v2443_v30, 1 }
 0x324   :  { %v2445_v8 = vmax.f32 %v2443_v30, %v2444_v47 }
 0x326   :  { %v2505_v11 = vsel %vm4060_vm12, %v2445_v8, %v2504_v55 }
 0x327   :  { %2513 = vst [vmem:[%s3979_s9 + $0x18] sm:$0xff] %v2505_v11 }

</bundles_post_ra>
